<compile_context>
chip_gen: v7x
topology: tpu7x:2x2x1
jax: 0.10.0
libtpu: 0.0.40
codegen_flags: <defaults>
</compile_context>

<pallas_src>
import functools
import math

import jax
import jax.numpy as jnp
import numpy as np
from jax.experimental import pallas as pl

# ---------------- config (small but consistent with the module) ----------------
D_MODEL = 32      # config.d_model
D_ID = 16         # config.d_id   (bits of the binary id embedding)
D_EMB = 16        # config.d_emb
D_FFN = 64        # config.d_ffn
N_HEADS = 4       # config.n_heads
N_LAYERS = 2      # config.n_layers
N_OUT = 8         # config.n_output_values
EPS = 1e-6
SLAB_WIDTH = 128  # lane-dense weight slab


# ------------------------------ weight slab layout -------------------------------
def _make_slab_layout():
    """Row layout of the packed weight slab. Every block starts on a multiple
    of 8 rows (sublane-tile aligned) and is zero-padded to 128 lanes."""
    entries = [
        ("cw1", (D_ID + D_EMB, D_MODEL)),
        ("cb1", (1, D_MODEL)),
        ("cw2", (D_MODEL, D_MODEL)),
        ("cb2", (1, D_MODEL)),
    ]
    for l in range(N_LAYERS):
        entries += [
            (f"ag{l}", (1, D_MODEL)),
            (f"wqkv{l}", (D_MODEL, 3 * D_MODEL)),
            (f"bqkv{l}", (1, 3 * D_MODEL)),
            (f"wo{l}", (D_MODEL, D_MODEL)),
            (f"bo{l}", (1, D_MODEL)),
            (f"fg{l}", (1, D_MODEL)),
            (f"w12{l}", (D_MODEL, 2 * D_FFN)),
            (f"b12{l}", (1, 2 * D_FFN)),
            (f"w3{l}", (D_FFN, D_MODEL)),
            (f"b3{l}", (1, D_MODEL)),
        ]
    entries += [
        ("norm", (1, D_MODEL)),
        ("hw1", (D_MODEL, D_MODEL)),
        ("hb1", (1, D_MODEL)),
        ("hw2", (D_MODEL, N_OUT)),
        ("hb2", (1, N_OUT)),
    ]
    layout = {}
    off = 0
    for name, (r, c) in entries:
        layout[name] = (off, r, c)
        off += ((r + 7) // 8) * 8
    return layout, off


SLAB_LAYOUT, SLAB_ROWS = _make_slab_layout()


def pack_params(params):
    """Build the single weight slab ONCE (outside the jitted per-call path)."""
    slab = np.zeros((SLAB_ROWS, SLAB_WIDTH), np.float32)

    def put(name, arr):
        off, r, c = SLAB_LAYOUT[name]
        slab[off:off + r, :c] = np.asarray(arr, np.float32).reshape(r, c)

    cw1, cb1, cw2, cb2 = params['correct_dim']
    put("cw1", cw1); put("cb1", cb1); put("cw2", cw2); put("cb2", cb2)
    for l, lp in enumerate(params['layers']):
        ag, wq, bq, wk, bk, wv, bv, wo, bo = lp['attn']
        fg, w1, b1, w2, b2, w3, b3 = lp['ffn']
        put(f"ag{l}", ag)
        put(f"wqkv{l}", np.concatenate([np.asarray(wq), np.asarray(wk), np.asarray(wv)], axis=1))
        put(f"bqkv{l}", np.concatenate([np.asarray(bq), np.asarray(bk), np.asarray(bv)], axis=1))
        put(f"wo{l}", wo); put(f"bo{l}", bo)
        put(f"fg{l}", fg)
        put(f"w12{l}", np.concatenate([np.asarray(w1), np.asarray(w2)], axis=1))
        put(f"b12{l}", np.concatenate([np.asarray(b1), np.asarray(b2)], axis=1))
        put(f"w3{l}", w3); put(f"b3{l}", b3)
    put("norm", params['norm'])
    hw1, hb1, hw2, hb2 = params['head']
    put("hw1", hw1); put("hb1", hb1); put("hw2", hw2); put("hb2", hb2)
    return jnp.asarray(slab)


# ---------------------------------- kernel --------------------------------------
def _rmsnorm(x, gamma):
    var = jnp.mean(x * x, axis=-1, keepdims=True)
    return x * jax.lax.rsqrt(var + EPS) * gamma


def fused_forward_kernel(c1_ref, c2_ref, e1_ref, e2_ref, slab_ref, o_ref, *,
                         batch, s1, s2, d_emb, n_heads, n_layers, d_id,
                         d_model, d_ffn, layout):
    """Whole theModel.forward in one kernel; weights carved from one slab."""
    seq = s1 + s2
    n_tok = batch * seq
    dh = d_model // n_heads
    scale = 1.0 / math.sqrt(dh)

    def w(name):                      # exact-width view (static, aligned slice)
        off, r, c = layout[name]
        return slab_ref[off:off + r, :c]

    def w_pad(name):                  # full 128-lane (zero-padded) view
        off, r, _ = layout[name]
        return slab_ref[off:off + r, :]

    # ---- input prep: +3000 offset, binary-id bits (MSB first), seq concat ----
    ids = jnp.concatenate([c1_ref[...], c2_ref[...] + 3000], axis=1)        # [B,S] i32
    exps = (d_id - 1) - jax.lax.broadcasted_iota(jnp.int32, (batch, seq, d_id), 2)
    bits = ((ids[..., None] >> exps) & 1).astype(jnp.float32)               # [B,S,d_id]
    emb = jnp.concatenate([e1_ref[...], e2_ref[...]], axis=1)               # [B,S,d_emb]
    bits = bits.reshape(n_tok, d_id)
    emb = emb.reshape(n_tok, d_emb).astype(jnp.float32)

    # ---- correct_dim: Linear -> ReLU -> (dropout = id) -> Linear ----
    # Feature concat [bits | emb] folded into a split matmul (no lane concat).
    cw1 = w("cw1")
    h = (jnp.dot(bits, cw1[:d_id, :], preferred_element_type=jnp.float32)
         + jnp.dot(emb, cw1[d_id:, :], preferred_element_type=jnp.float32)
         + w("cb1"))
    h = jnp.maximum(h, 0.0)
    x = jnp.dot(h, w("cw2"), preferred_element_type=jnp.float32) + w("cb2")  # [n_tok,D]

    # ---- static block-diagonal mask: tokens attend only within their batch ----
    r_iota = jax.lax.broadcasted_iota(jnp.int32, (n_tok, n_tok), 0)
    c_iota = jax.lax.broadcasted_iota(jnp.int32, (n_tok, n_tok), 1)
    if seq & (seq - 1) == 0:
        sh = seq.bit_length() - 1
        same_batch = (r_iota >> sh) == (c_iota >> sh)
    else:
        same_batch = (r_iota // seq) == (c_iota // seq)
    mask = jnp.where(same_batch, 0.0, -1e30).astype(jnp.float32)

    # ---- transformer blocks (static Python loop; everything stays in vregs) ----
    for l in range(n_layers):
        # -- attention: x = x + out_proj(MHA(RMSNorm(x)))
        hn = _rmsnorm(x, w(f"ag{l}"))
        qkv = (jnp.dot(hn, w_pad(f"wqkv{l}"), preferred_element_type=jnp.float32)
               + w_pad(f"bqkv{l}"))                       # [n_tok,128] full-lane write
        wo = w(f"wo{l}")
        attn = w(f"bo{l}")                                # accumulate from bias
        for hd in range(n_heads):
            qh = qkv[:, hd * dh:(hd + 1) * dh]
            kh = qkv[:, d_model + hd * dh:d_model + (hd + 1) * dh]
            vh = qkv[:, 2 * d_model + hd * dh:2 * d_model + (hd + 1) * dh]
            s = jax.lax.dot_general(qh, kh, (((1,), (1,)), ((), ())),
                                    preferred_element_type=jnp.float32) * scale + mask
            s = s - jnp.max(s, axis=-1, keepdims=True)
            p = jnp.exp(s)
            p = p * pl.reciprocal(jnp.sum(p, axis=-1, keepdims=True), approx=True)
            oh = jnp.dot(p, vh, preferred_element_type=jnp.float32)          # [n_tok,dh]
            # distribute the output projection per head (no concat, no scratch)
            attn = attn + jnp.dot(oh, wo[hd * dh:(hd + 1) * dh, :],
                                  preferred_element_type=jnp.float32)
        x = x + attn

        # -- gated FFN: x = x + w3(SiLU(w1 h) * (w2 h)),  h = RMSNorm(x)
        hn = _rmsnorm(x, w(f"fg{l}"))
        ab = jnp.dot(hn, w(f"w12{l}"), preferred_element_type=jnp.float32) + w(f"b12{l}")
        a = ab[:, :d_ffn]
        b = ab[:, d_ffn:]
        x = x + jnp.dot(a * jax.nn.sigmoid(a) * b, w(f"w3{l}"),
                        preferred_element_type=jnp.float32) + w(f"b3{l}")

    # ---- CLS rows first (B rows), THEN final RMSNorm + head MLP ----
    x0 = x.reshape(batch, seq, d_model)[:, 0, :]          # [B, D]
    x0 = _rmsnorm(x0, w("norm"))
    h = jnp.maximum(jnp.dot(x0, w("hw1"), preferred_element_type=jnp.float32) + w("hb1"), 0.0)
    logits = jnp.dot(h, w("hw2"), preferred_element_type=jnp.float32) + w("hb2")
    o_ref[...] = logits.astype(o_ref.dtype)


# --------------------------------- wrapper --------------------------------------
def model_forward(slab, contig1, contig2, emb1, emb2):
    """No wrapper-side XLA ops: raw inputs + the pre-packed weight slab go
    straight into a single pallas_call."""
    B, S1 = contig1.shape
    S2 = contig2.shape[1]
    kernel = functools.partial(
        fused_forward_kernel,
        batch=B, s1=S1, s2=S2, d_emb=emb1.shape[-1],
        n_heads=N_HEADS, n_layers=N_LAYERS, d_id=D_ID,
        d_model=D_MODEL, d_ffn=D_FFN, layout=SLAB_LAYOUT)
    logits = pl.pallas_call(
        kernel,
        out_shape=jax.ShapeDtypeStruct((B, N_OUT), jnp.float32),
    )(contig1, contig2, emb1, emb2, slab)
    return {'logits': logits}


# ------------------------------ parameter init ----------------------------------
def init_params(key):
    def linear(k, din, dout, scale=0.05):
        kw, kb = jax.random.split(k)
        return (scale * jax.random.normal(kw, (din, dout), jnp.float32),
                scale * jax.random.normal(kb, (1, dout), jnp.float32))

    keys = jax.random.split(key, 3 + N_LAYERS)
    params = {}
    k1, k2 = jax.random.split(keys[0])
    params['correct_dim'] = (*linear(k1, D_EMB + D_ID, D_MODEL),
                             *linear(k2, D_MODEL, D_MODEL))
    layers = []
    for i in range(N_LAYERS):
        k = jax.random.split(keys[1 + i], 7)
        wq, bq = linear(k[0], D_MODEL, D_MODEL)
        wk, bk = linear(k[1], D_MODEL, D_MODEL)
        wv, bv = linear(k[2], D_MODEL, D_MODEL)
        wo, bo = linear(k[3], D_MODEL, D_MODEL)
        w1, b1 = linear(k[4], D_MODEL, D_FFN)
        w2, b2 = linear(k[5], D_MODEL, D_FFN)
        w3, b3 = linear(k[6], D_FFN, D_MODEL)
        layers.append({
            'attn': (jnp.ones((1, D_MODEL), jnp.float32), wq, bq, wk, bk, wv, bv, wo, bo),
            'ffn': (jnp.ones((1, D_MODEL), jnp.float32), w1, b1, w2, b2, w3, b3),
        })
    params['layers'] = layers
    params['norm'] = jnp.ones((1, D_MODEL), jnp.float32)
    kh1, kh2 = jax.random.split(keys[2])
    params['head'] = (*linear(kh1, D_MODEL, D_MODEL), *linear(kh2, D_MODEL, N_OUT))
    return params


# --------------------------- pure-JAX reference (check) --------------------------
def reference_forward(params, contig1, contig2, emb1, emb2):
    def dec2bin(x, bits):
        e = (bits - 1) - jnp.arange(bits)
        return ((x[..., None].astype(jnp.int32) >> e) & 1).astype(jnp.float32)

    def rms(x, g):
        return x * jax.lax.rsqrt(jnp.mean(x * x, -1, keepdims=True) + EPS) * g[0]

    contig2 = contig2 + 3000
    x = jnp.concatenate([jnp.concatenate([dec2bin(contig1, D_ID), emb1], -1),
                         jnp.concatenate([dec2bin(contig2, D_ID), emb2], -1)], 1)
    w1, b1, w2, b2 = params['correct_dim']
    x = jnp.maximum(x @ w1 + b1[0], 0.0) @ w2 + b2[0]
    for lp in params['layers']:
        g, wq, bq, wk, bk, wv, bv, wo, bo = lp['attn']
        h = rms(x, g)
        B, S, D = x.shape
        dh = D // N_HEADS
        q = (h @ wq + bq[0]).reshape(B, S, N_HEADS, dh).transpose(0, 2, 1, 3)
        k = (h @ wk + bk[0]).reshape(B, S, N_HEADS, dh).transpose(0, 2, 1, 3)
        v = (h @ wv + bv[0]).reshape(B, S, N_HEADS, dh).transpose(0, 2, 1, 3)
        s = jnp.einsum('bhqd,bhkd->bhqk', q, k) / math.sqrt(dh)
        p = jax.nn.softmax(s, -1)
        o = jnp.einsum('bhqk,bhkd->bhqd', p, v).transpose(0, 2, 1, 3).reshape(B, S, D)
        x = x + o @ wo + bo[0]
        g, wf1, bf1, wf2, bf2, wf3, bf3 = lp['ffn']
        h = rms(x, g)
        a = h @ wf1 + bf1[0]
        x = x + ((a * jax.nn.sigmoid(a)) * (h @ wf2 + bf2[0])) @ wf3 + bf3[0]
    x = rms(x, params['norm'])[:, 0, :]
    wh1, bh1, wh2, bh2 = params['head']
    return jnp.maximum(x @ wh1 + bh1[0], 0.0) @ wh2 + bh2[0]


# ------------------------------------- main --------------------------------------
if __name__ == "__main__":
    key = jax.random.PRNGKey(0)
    kp, k1, k2, k3, k4 = jax.random.split(key, 5)
    params = init_params(kp)
    slab = pack_params(params)          # one-time weight packing (outside jit)

    B, S1, S2 = 2, 4, 4
    contig1 = jax.random.randint(k1, (B, S1), 0, 1000, dtype=jnp.int32)
    contig2 = jax.random.randint(k2, (B, S2), 0, 1000, dtype=jnp.int32)
    emb1 = jax.random.normal(k3, (B, S1, D_EMB), jnp.float32)
    emb2 = jax.random.normal(k4, (B, S2, D_EMB), jnp.float32)

    fwd = jax.jit(model_forward)
    out = fwd(slab, contig1, contig2, emb1, emb2)
    logits = jax.block_until_ready(out['logits'])

    ref = reference_forward(params, contig1, contig2, emb1, emb2)
    np.testing.assert_allclose(np.asarray(logits), np.asarray(ref), rtol=2e-2, atol=2e-2)
    print("KERNEL_OK")
</pallas_src>

<mosaic_0001>
module attributes {stable_mosaic.version = 11 : i64} {
  func.func @fused_forward_kernel(%arg0: memref<2x4xi32, #tpu.memory_space<vmem>>, %arg1: memref<2x4xi32, #tpu.memory_space<vmem>>, %arg2: memref<2x4x16xf32, #tpu.memory_space<vmem>>, %arg3: memref<2x4x16xf32, #tpu.memory_space<vmem>>, %arg4: memref<584x128xf32, #tpu.memory_space<vmem>>, %arg5: memref<2x8xf32, #tpu.memory_space<vmem>>) attributes {dimension_semantics = [], scalar_prefetch = 0 : i64, scratch_operands = 0 : i64, tpu.core_type = #tpu.core_type<tc>} {
    %c0 = arith.constant 0 : index
    %c0_0 = arith.constant 0 : index
    %0 = vector.load %arg0[%c0, %c0_0] : memref<2x4xi32, #tpu.memory_space<vmem>>, vector<2x4xi32>
    %c0_1 = arith.constant 0 : index
    %c0_2 = arith.constant 0 : index
    %1 = vector.load %arg1[%c0_1, %c0_2] : memref<2x4xi32, #tpu.memory_space<vmem>>, vector<2x4xi32>
    %c3000_i32 = arith.constant 3000 : i32
    %2 = vector.broadcast %c3000_i32 : i32 to vector<2x4xi32>
    %3 = arith.addi %1, %2 : vector<2x4xi32>
    %4 = tpu.concatenate %0, %3 in 1 : vector<2x4xi32>, vector<2x4xi32> -> vector<2x8xi32>
    %5 = tpu.iota {dimensions = array<i32: 2>} : vector<2x8x16xi32>
    %c15_i32 = arith.constant 15 : i32
    %6 = vector.broadcast %c15_i32 : i32 to vector<2x8x16xi32>
    %7 = arith.subi %6, %5 : vector<2x8x16xi32>
    %8 = vector.shape_cast %4 : vector<2x8xi32> to vector<2x8x1xi32>
    %9 = vector.broadcast %8 : vector<2x8x1xi32> to vector<2x8x16xi32>
    %10 = arith.shrsi %9, %7 : vector<2x8x16xi32>
    %c1_i32 = arith.constant 1 : i32
    %11 = vector.broadcast %c1_i32 : i32 to vector<2x8x16xi32>
    %12 = arith.andi %10, %11 : vector<2x8x16xi32>
    %13 = arith.sitofp %12 : vector<2x8x16xi32> to vector<2x8x16xf32>
    %c0_3 = arith.constant 0 : index
    %c0_4 = arith.constant 0 : index
    %c0_5 = arith.constant 0 : index
    %14 = vector.load %arg2[%c0_3, %c0_4, %c0_5] : memref<2x4x16xf32, #tpu.memory_space<vmem>>, vector<2x4x16xf32>
    %c0_6 = arith.constant 0 : index
    %c0_7 = arith.constant 0 : index
    %c0_8 = arith.constant 0 : index
    %15 = vector.load %arg3[%c0_6, %c0_7, %c0_8] : memref<2x4x16xf32, #tpu.memory_space<vmem>>, vector<2x4x16xf32>
    %16 = tpu.concatenate %14, %15 in 1 : vector<2x4x16xf32>, vector<2x4x16xf32> -> vector<2x8x16xf32>
    %17 = vector.shape_cast %13 : vector<2x8x16xf32> to vector<16x16xf32>
    %18 = vector.shape_cast %16 : vector<2x8x16xf32> to vector<16x16xf32>
    %c0_9 = arith.constant 0 : index
    %c0_10 = arith.constant 0 : index
    %19 = vector.load %arg4[%c0_9, %c0_10] : memref<584x128xf32, #tpu.memory_space<vmem>>, vector<32x32xf32>
    %20 = vector.extract_strided_slice %19 {offsets = [0, 0], sizes = [16, 32], strides = [1, 1]} : vector<32x32xf32> to vector<16x32xf32>
    %cst = arith.constant dense<0.000000e+00> : vector<16x32xf32>
    %21 = tpu.matmul %17, %20, %cst {dimension_numbers = #tpu.dot_dimension_numbers<[1], [0], [0], [1], [0, 0, 1, 1], [], []>} : vector<16x16xf32>, vector<16x32xf32>, vector<16x32xf32> -> vector<16x32xf32>
    %22 = vector.extract_strided_slice %19 {offsets = [16, 0], sizes = [16, 32], strides = [1, 1]} : vector<32x32xf32> to vector<16x32xf32>
    %cst_11 = arith.constant dense<0.000000e+00> : vector<16x32xf32>
    %23 = tpu.matmul %18, %22, %cst_11 {dimension_numbers = #tpu.dot_dimension_numbers<[1], [0], [0], [1], [0, 0, 1, 1], [], []>} : vector<16x16xf32>, vector<16x32xf32>, vector<16x32xf32> -> vector<16x32xf32>
    %24 = arith.addf %21, %23 : vector<16x32xf32>
    %c32 = arith.constant 32 : index
    %c0_12 = arith.constant 0 : index
    %25 = vector.load %arg4[%c32, %c0_12] : memref<584x128xf32, #tpu.memory_space<vmem>>, vector<1x32xf32>
    %26 = vector.broadcast %25 : vector<1x32xf32> to vector<16x32xf32>
    %27 = arith.addf %24, %26 : vector<16x32xf32>
    %cst_13 = arith.constant 0.000000e+00 : f32
    %28 = vector.broadcast %cst_13 : f32 to vector<16x32xf32>
    %29 = arith.maximumf %27, %28 : vector<16x32xf32>
    %c40 = arith.constant 40 : index
    %c0_14 = arith.constant 0 : index
    %30 = vector.load %arg4[%c40, %c0_14] : memref<584x128xf32, #tpu.memory_space<vmem>>, vector<32x32xf32>
    %cst_15 = arith.constant dense<0.000000e+00> : vector<16x32xf32>
    %31 = tpu.matmul %29, %30, %cst_15 {dimension_numbers = #tpu.dot_dimension_numbers<[1], [0], [0], [1], [0, 0, 1, 1], [], []>} : vector<16x32xf32>, vector<32x32xf32>, vector<16x32xf32> -> vector<16x32xf32>
    %c72 = arith.constant 72 : index
    %c0_16 = arith.constant 0 : index
    %32 = vector.load %arg4[%c72, %c0_16] : memref<584x128xf32, #tpu.memory_space<vmem>>, vector<1x32xf32>
    %33 = vector.broadcast %32 : vector<1x32xf32> to vector<16x32xf32>
    %34 = arith.addf %31, %33 : vector<16x32xf32>
    %35 = tpu.iota {dimensions = array<i32: 0>} : vector<16x16xi32>
    %36 = tpu.iota {dimensions = array<i32: 1>} : vector<16x16xi32>
    %c3_i32 = arith.constant 3 : i32
    %37 = vector.broadcast %c3_i32 : i32 to vector<16x16xi32>
    %38 = arith.shrsi %35, %37 : vector<16x16xi32>
    %c3_i32_17 = arith.constant 3 : i32
    %39 = vector.broadcast %c3_i32_17 : i32 to vector<16x16xi32>
    %40 = arith.shrsi %36, %39 : vector<16x16xi32>
    %41 = arith.cmpi eq, %38, %40 : vector<16x16xi32>
    %cst_18 = arith.constant 0.000000e+00 : f32
    %cst_19 = arith.constant -1.000000e+30 : f32
    %42 = vector.broadcast %cst_18 : f32 to vector<16x16xf32>
    %43 = vector.broadcast %cst_19 : f32 to vector<16x16xf32>
    %44 = arith.select %41, %42, %43 : vector<16x16xi1>, vector<16x16xf32>
    %c80 = arith.constant 80 : index
    %c0_20 = arith.constant 0 : index
    %45 = vector.load %arg4[%c80, %c0_20] : memref<584x128xf32, #tpu.memory_space<vmem>>, vector<1x32xf32>
    %46 = arith.mulf %34, %34 : vector<16x32xf32>
    %cst_21 = arith.constant dense<0.000000e+00> : vector<16xf32>
    %47 = vector.multi_reduction <add>, %46, %cst_21 [1] : vector<16x32xf32> to vector<16xf32>
    %48 = vector.shape_cast %47 : vector<16xf32> to vector<16x1xf32>
    %cst_22 = arith.constant 3.200000e+01 : f32
    %49 = vector.broadcast %cst_22 : f32 to vector<16x1xf32>
    %50 = arith.divf %48, %49 : vector<16x1xf32>
    %cst_23 = arith.constant 9.99999997E-7 : f32
    %51 = vector.broadcast %cst_23 : f32 to vector<16x1xf32>
    %52 = arith.addf %50, %51 : vector<16x1xf32>
    %53 = math.rsqrt %52 : vector<16x1xf32>
    %54 = vector.broadcast %53 : vector<16x1xf32> to vector<16x32xf32>
    %55 = arith.mulf %34, %54 : vector<16x32xf32>
    %56 = vector.broadcast %45 : vector<1x32xf32> to vector<16x32xf32>
    %57 = arith.mulf %55, %56 : vector<16x32xf32>
    %c88 = arith.constant 88 : index
    %c0_24 = arith.constant 0 : index
    %58 = vector.load %arg4[%c88, %c0_24] : memref<584x128xf32, #tpu.memory_space<vmem>>, vector<32x128xf32>
    %cst_25 = arith.constant dense<0.000000e+00> : vector<16x128xf32>
    %59 = tpu.matmul %57, %58, %cst_25 {dimension_numbers = #tpu.dot_dimension_numbers<[1], [0], [0], [1], [0, 0, 1, 1], [], []>} : vector<16x32xf32>, vector<32x128xf32>, vector<16x128xf32> -> vector<16x128xf32>
    %c120 = arith.constant 120 : index
    %c0_26 = arith.constant 0 : index
    %60 = vector.load %arg4[%c120, %c0_26] : memref<584x128xf32, #tpu.memory_space<vmem>>, vector<1x128xf32>
    %61 = vector.broadcast %60 : vector<1x128xf32> to vector<16x128xf32>
    %62 = arith.addf %59, %61 : vector<16x128xf32>
    %c128 = arith.constant 128 : index
    %c0_27 = arith.constant 0 : index
    %63 = vector.load %arg4[%c128, %c0_27] : memref<584x128xf32, #tpu.memory_space<vmem>>, vector<32x32xf32>
    %c160 = arith.constant 160 : index
    %c0_28 = arith.constant 0 : index
    %64 = vector.load %arg4[%c160, %c0_28] : memref<584x128xf32, #tpu.memory_space<vmem>>, vector<1x32xf32>
    %65 = vector.extract_strided_slice %62 {offsets = [0, 0], sizes = [16, 8], strides = [1, 1]} : vector<16x128xf32> to vector<16x8xf32>
    %66 = vector.extract_strided_slice %62 {offsets = [0, 32], sizes = [16, 8], strides = [1, 1]} : vector<16x128xf32> to vector<16x8xf32>
    %67 = vector.extract_strided_slice %62 {offsets = [0, 64], sizes = [16, 8], strides = [1, 1]} : vector<16x128xf32> to vector<16x8xf32>
    %cst_29 = arith.constant dense<0.000000e+00> : vector<16x16xf32>
    %68 = tpu.matmul %65, %66, %cst_29 {dimension_numbers = #tpu.dot_dimension_numbers<[1], [1], [0], [0], [0, 0, 1, 0], [], []>} : vector<16x8xf32>, vector<16x8xf32>, vector<16x16xf32> -> vector<16x16xf32>
    %cst_30 = arith.constant 0.353553385 : f32
    %69 = vector.broadcast %cst_30 : f32 to vector<16x16xf32>
    %70 = arith.mulf %68, %69 : vector<16x16xf32>
    %71 = arith.addf %70, %44 : vector<16x16xf32>
    %cst_31 = arith.constant dense<0xFF800000> : vector<16xf32>
    %72 = vector.multi_reduction <maximumf>, %71, %cst_31 [1] : vector<16x16xf32> to vector<16xf32>
    %73 = vector.shape_cast %72 : vector<16xf32> to vector<16x1xf32>
    %74 = vector.broadcast %73 : vector<16x1xf32> to vector<16x16xf32>
    %75 = arith.subf %71, %74 : vector<16x16xf32>
    %76 = math.exp %75 : vector<16x16xf32>
    %cst_32 = arith.constant dense<0.000000e+00> : vector<16xf32>
    %77 = vector.multi_reduction <add>, %76, %cst_32 [1] : vector<16x16xf32> to vector<16xf32>
    %78 = vector.shape_cast %77 : vector<16xf32> to vector<16x1xf32>
    %79 = tpu.reciprocal %78 {approx = true} : vector<16x1xf32> -> vector<16x1xf32>
    %80 = vector.broadcast %79 : vector<16x1xf32> to vector<16x16xf32>
    %81 = arith.mulf %76, %80 : vector<16x16xf32>
    %cst_33 = arith.constant dense<0.000000e+00> : vector<16x8xf32>
    %82 = tpu.matmul %81, %67, %cst_33 {dimension_numbers = #tpu.dot_dimension_numbers<[1], [0], [0], [1], [0, 0, 1, 1], [], []>} : vector<16x16xf32>, vector<16x8xf32>, vector<16x8xf32> -> vector<16x8xf32>
    %83 = vector.extract_strided_slice %63 {offsets = [0, 0], sizes = [8, 32], strides = [1, 1]} : vector<32x32xf32> to vector<8x32xf32>
    %cst_34 = arith.constant dense<0.000000e+00> : vector<16x32xf32>
    %84 = tpu.matmul %82, %83, %cst_34 {dimension_numbers = #tpu.dot_dimension_numbers<[1], [0], [0], [1], [0, 0, 1, 1], [], []>} : vector<16x8xf32>, vector<8x32xf32>, vector<16x32xf32> -> vector<16x32xf32>
    %85 = vector.broadcast %64 : vector<1x32xf32> to vector<16x32xf32>
    %86 = arith.addf %85, %84 : vector<16x32xf32>
    %87 = vector.extract_strided_slice %62 {offsets = [0, 8], sizes = [16, 8], strides = [1, 1]} : vector<16x128xf32> to vector<16x8xf32>
    %88 = vector.extract_strided_slice %62 {offsets = [0, 40], sizes = [16, 8], strides = [1, 1]} : vector<16x128xf32> to vector<16x8xf32>
    %89 = vector.extract_strided_slice %62 {offsets = [0, 72], sizes = [16, 8], strides = [1, 1]} : vector<16x128xf32> to vector<16x8xf32>
    %cst_35 = arith.constant dense<0.000000e+00> : vector<16x16xf32>
    %90 = tpu.matmul %87, %88, %cst_35 {dimension_numbers = #tpu.dot_dimension_numbers<[1], [1], [0], [0], [0, 0, 1, 0], [], []>} : vector<16x8xf32>, vector<16x8xf32>, vector<16x16xf32> -> vector<16x16xf32>
    %cst_36 = arith.constant 0.353553385 : f32
    %91 = vector.broadcast %cst_36 : f32 to vector<16x16xf32>
    %92 = arith.mulf %90, %91 : vector<16x16xf32>
    %93 = arith.addf %92, %44 : vector<16x16xf32>
    %cst_37 = arith.constant dense<0xFF800000> : vector<16xf32>
    %94 = vector.multi_reduction <maximumf>, %93, %cst_37 [1] : vector<16x16xf32> to vector<16xf32>
    %95 = vector.shape_cast %94 : vector<16xf32> to vector<16x1xf32>
    %96 = vector.broadcast %95 : vector<16x1xf32> to vector<16x16xf32>
    %97 = arith.subf %93, %96 : vector<16x16xf32>
    %98 = math.exp %97 : vector<16x16xf32>
    %cst_38 = arith.constant dense<0.000000e+00> : vector<16xf32>
    %99 = vector.multi_reduction <add>, %98, %cst_38 [1] : vector<16x16xf32> to vector<16xf32>
    %100 = vector.shape_cast %99 : vector<16xf32> to vector<16x1xf32>
    %101 = tpu.reciprocal %100 {approx = true} : vector<16x1xf32> -> vector<16x1xf32>
    %102 = vector.broadcast %101 : vector<16x1xf32> to vector<16x16xf32>
    %103 = arith.mulf %98, %102 : vector<16x16xf32>
    %cst_39 = arith.constant dense<0.000000e+00> : vector<16x8xf32>
    %104 = tpu.matmul %103, %89, %cst_39 {dimension_numbers = #tpu.dot_dimension_numbers<[1], [0], [0], [1], [0, 0, 1, 1], [], []>} : vector<16x16xf32>, vector<16x8xf32>, vector<16x8xf32> -> vector<16x8xf32>
    %105 = vector.extract_strided_slice %63 {offsets = [8, 0], sizes = [8, 32], strides = [1, 1]} : vector<32x32xf32> to vector<8x32xf32>
    %cst_40 = arith.constant dense<0.000000e+00> : vector<16x32xf32>
    %106 = tpu.matmul %104, %105, %cst_40 {dimension_numbers = #tpu.dot_dimension_numbers<[1], [0], [0], [1], [0, 0, 1, 1], [], []>} : vector<16x8xf32>, vector<8x32xf32>, vector<16x32xf32> -> vector<16x32xf32>
    %107 = arith.addf %86, %106 : vector<16x32xf32>
    %108 = vector.extract_strided_slice %62 {offsets = [0, 16], sizes = [16, 8], strides = [1, 1]} : vector<16x128xf32> to vector<16x8xf32>
    %109 = vector.extract_strided_slice %62 {offsets = [0, 48], sizes = [16, 8], strides = [1, 1]} : vector<16x128xf32> to vector<16x8xf32>
    %110 = vector.extract_strided_slice %62 {offsets = [0, 80], sizes = [16, 8], strides = [1, 1]} : vector<16x128xf32> to vector<16x8xf32>
    %cst_41 = arith.constant dense<0.000000e+00> : vector<16x16xf32>
    %111 = tpu.matmul %108, %109, %cst_41 {dimension_numbers = #tpu.dot_dimension_numbers<[1], [1], [0], [0], [0, 0, 1, 0], [], []>} : vector<16x8xf32>, vector<16x8xf32>, vector<16x16xf32> -> vector<16x16xf32>
    %cst_42 = arith.constant 0.353553385 : f32
    %112 = vector.broadcast %cst_42 : f32 to vector<16x16xf32>
    %113 = arith.mulf %111, %112 : vector<16x16xf32>
    %114 = arith.addf %113, %44 : vector<16x16xf32>
    %cst_43 = arith.constant dense<0xFF800000> : vector<16xf32>
    %115 = vector.multi_reduction <maximumf>, %114, %cst_43 [1] : vector<16x16xf32> to vector<16xf32>
    %116 = vector.shape_cast %115 : vector<16xf32> to vector<16x1xf32>
    %117 = vector.broadcast %116 : vector<16x1xf32> to vector<16x16xf32>
    %118 = arith.subf %114, %117 : vector<16x16xf32>
    %119 = math.exp %118 : vector<16x16xf32>
    %cst_44 = arith.constant dense<0.000000e+00> : vector<16xf32>
    %120 = vector.multi_reduction <add>, %119, %cst_44 [1] : vector<16x16xf32> to vector<16xf32>
    %121 = vector.shape_cast %120 : vector<16xf32> to vector<16x1xf32>
    %122 = tpu.reciprocal %121 {approx = true} : vector<16x1xf32> -> vector<16x1xf32>
    %123 = vector.broadcast %122 : vector<16x1xf32> to vector<16x16xf32>
    %124 = arith.mulf %119, %123 : vector<16x16xf32>
    %cst_45 = arith.constant dense<0.000000e+00> : vector<16x8xf32>
    %125 = tpu.matmul %124, %110, %cst_45 {dimension_numbers = #tpu.dot_dimension_numbers<[1], [0], [0], [1], [0, 0, 1, 1], [], []>} : vector<16x16xf32>, vector<16x8xf32>, vector<16x8xf32> -> vector<16x8xf32>
    %126 = vector.extract_strided_slice %63 {offsets = [16, 0], sizes = [8, 32], strides = [1, 1]} : vector<32x32xf32> to vector<8x32xf32>
    %cst_46 = arith.constant dense<0.000000e+00> : vector<16x32xf32>
    %127 = tpu.matmul %125, %126, %cst_46 {dimension_numbers = #tpu.dot_dimension_numbers<[1], [0], [0], [1], [0, 0, 1, 1], [], []>} : vector<16x8xf32>, vector<8x32xf32>, vector<16x32xf32> -> vector<16x32xf32>
    %128 = arith.addf %107, %127 : vector<16x32xf32>
    %129 = vector.extract_strided_slice %62 {offsets = [0, 24], sizes = [16, 8], strides = [1, 1]} : vector<16x128xf32> to vector<16x8xf32>
    %130 = vector.extract_strided_slice %62 {offsets = [0, 56], sizes = [16, 8], strides = [1, 1]} : vector<16x128xf32> to vector<16x8xf32>
    %131 = vector.extract_strided_slice %62 {offsets = [0, 88], sizes = [16, 8], strides = [1, 1]} : vector<16x128xf32> to vector<16x8xf32>
    %cst_47 = arith.constant dense<0.000000e+00> : vector<16x16xf32>
    %132 = tpu.matmul %129, %130, %cst_47 {dimension_numbers = #tpu.dot_dimension_numbers<[1], [1], [0], [0], [0, 0, 1, 0], [], []>} : vector<16x8xf32>, vector<16x8xf32>, vector<16x16xf32> -> vector<16x16xf32>
    %cst_48 = arith.constant 0.353553385 : f32
    %133 = vector.broadcast %cst_48 : f32 to vector<16x16xf32>
    %134 = arith.mulf %132, %133 : vector<16x16xf32>
    %135 = arith.addf %134, %44 : vector<16x16xf32>
    %cst_49 = arith.constant dense<0xFF800000> : vector<16xf32>
    %136 = vector.multi_reduction <maximumf>, %135, %cst_49 [1] : vector<16x16xf32> to vector<16xf32>
    %137 = vector.shape_cast %136 : vector<16xf32> to vector<16x1xf32>
    %138 = vector.broadcast %137 : vector<16x1xf32> to vector<16x16xf32>
    %139 = arith.subf %135, %138 : vector<16x16xf32>
    %140 = math.exp %139 : vector<16x16xf32>
    %cst_50 = arith.constant dense<0.000000e+00> : vector<16xf32>
    %141 = vector.multi_reduction <add>, %140, %cst_50 [1] : vector<16x16xf32> to vector<16xf32>
    %142 = vector.shape_cast %141 : vector<16xf32> to vector<16x1xf32>
    %143 = tpu.reciprocal %142 {approx = true} : vector<16x1xf32> -> vector<16x1xf32>
    %144 = vector.broadcast %143 : vector<16x1xf32> to vector<16x16xf32>
    %145 = arith.mulf %140, %144 : vector<16x16xf32>
    %cst_51 = arith.constant dense<0.000000e+00> : vector<16x8xf32>
    %146 = tpu.matmul %145, %131, %cst_51 {dimension_numbers = #tpu.dot_dimension_numbers<[1], [0], [0], [1], [0, 0, 1, 1], [], []>} : vector<16x16xf32>, vector<16x8xf32>, vector<16x8xf32> -> vector<16x8xf32>
    %147 = vector.extract_strided_slice %63 {offsets = [24, 0], sizes = [8, 32], strides = [1, 1]} : vector<32x32xf32> to vector<8x32xf32>
    %cst_52 = arith.constant dense<0.000000e+00> : vector<16x32xf32>
    %148 = tpu.matmul %146, %147, %cst_52 {dimension_numbers = #tpu.dot_dimension_numbers<[1], [0], [0], [1], [0, 0, 1, 1], [], []>} : vector<16x8xf32>, vector<8x32xf32>, vector<16x32xf32> -> vector<16x32xf32>
    %149 = arith.addf %128, %148 : vector<16x32xf32>
    %150 = arith.addf %34, %149 : vector<16x32xf32>
    %c168 = arith.constant 168 : index
    %c0_53 = arith.constant 0 : index
    %151 = vector.load %arg4[%c168, %c0_53] : memref<584x128xf32, #tpu.memory_space<vmem>>, vector<1x32xf32>
    %152 = arith.mulf %150, %150 : vector<16x32xf32>
    %cst_54 = arith.constant dense<0.000000e+00> : vector<16xf32>
    %153 = vector.multi_reduction <add>, %152, %cst_54 [1] : vector<16x32xf32> to vector<16xf32>
    %154 = vector.shape_cast %153 : vector<16xf32> to vector<16x1xf32>
    %cst_55 = arith.constant 3.200000e+01 : f32
    %155 = vector.broadcast %cst_55 : f32 to vector<16x1xf32>
    %156 = arith.divf %154, %155 : vector<16x1xf32>
    %cst_56 = arith.constant 9.99999997E-7 : f32
    %157 = vector.broadcast %cst_56 : f32 to vector<16x1xf32>
    %158 = arith.addf %156, %157 : vector<16x1xf32>
    %159 = math.rsqrt %158 : vector<16x1xf32>
    %160 = vector.broadcast %159 : vector<16x1xf32> to vector<16x32xf32>
    %161 = arith.mulf %150, %160 : vector<16x32xf32>
    %162 = vector.broadcast %151 : vector<1x32xf32> to vector<16x32xf32>
    %163 = arith.mulf %161, %162 : vector<16x32xf32>
    %c176 = arith.constant 176 : index
    %c0_57 = arith.constant 0 : index
    %164 = vector.load %arg4[%c176, %c0_57] : memref<584x128xf32, #tpu.memory_space<vmem>>, vector<32x128xf32>
    %cst_58 = arith.constant dense<0.000000e+00> : vector<16x128xf32>
    %165 = tpu.matmul %163, %164, %cst_58 {dimension_numbers = #tpu.dot_dimension_numbers<[1], [0], [0], [1], [0, 0, 1, 1], [], []>} : vector<16x32xf32>, vector<32x128xf32>, vector<16x128xf32> -> vector<16x128xf32>
    %c208 = arith.constant 208 : index
    %c0_59 = arith.constant 0 : index
    %166 = vector.load %arg4[%c208, %c0_59] : memref<584x128xf32, #tpu.memory_space<vmem>>, vector<1x128xf32>
    %167 = vector.broadcast %166 : vector<1x128xf32> to vector<16x128xf32>
    %168 = arith.addf %165, %167 : vector<16x128xf32>
    %169 = vector.extract_strided_slice %168 {offsets = [0, 0], sizes = [16, 64], strides = [1, 1]} : vector<16x128xf32> to vector<16x64xf32>
    %170 = vector.extract_strided_slice %168 {offsets = [0, 64], sizes = [16, 64], strides = [1, 1]} : vector<16x128xf32> to vector<16x64xf32>
    %171 = arith.negf %169 : vector<16x64xf32>
    %172 = math.exp %171 : vector<16x64xf32>
    %cst_60 = arith.constant 1.000000e+00 : f32
    %173 = vector.broadcast %cst_60 : f32 to vector<16x64xf32>
    %174 = arith.addf %173, %172 : vector<16x64xf32>
    %175 = arith.divf %173, %174 : vector<16x64xf32>
    %176 = arith.mulf %169, %175 : vector<16x64xf32>
    %177 = arith.mulf %176, %170 : vector<16x64xf32>
    %c216 = arith.constant 216 : index
    %c0_61 = arith.constant 0 : index
    %178 = vector.load %arg4[%c216, %c0_61] : memref<584x128xf32, #tpu.memory_space<vmem>>, vector<64x32xf32>
    %cst_62 = arith.constant dense<0.000000e+00> : vector<16x32xf32>
    %179 = tpu.matmul %177, %178, %cst_62 {dimension_numbers = #tpu.dot_dimension_numbers<[1], [0], [0], [1], [0, 0, 1, 1], [], []>} : vector<16x64xf32>, vector<64x32xf32>, vector<16x32xf32> -> vector<16x32xf32>
    %180 = arith.addf %150, %179 : vector<16x32xf32>
    %c280 = arith.constant 280 : index
    %c0_63 = arith.constant 0 : index
    %181 = vector.load %arg4[%c280, %c0_63] : memref<584x128xf32, #tpu.memory_space<vmem>>, vector<1x32xf32>
    %182 = vector.broadcast %181 : vector<1x32xf32> to vector<16x32xf32>
    %183 = arith.addf %180, %182 : vector<16x32xf32>
    %c288 = arith.constant 288 : index
    %c0_64 = arith.constant 0 : index
    %184 = vector.load %arg4[%c288, %c0_64] : memref<584x128xf32, #tpu.memory_space<vmem>>, vector<1x32xf32>
    %185 = arith.mulf %183, %183 : vector<16x32xf32>
    %cst_65 = arith.constant dense<0.000000e+00> : vector<16xf32>
    %186 = vector.multi_reduction <add>, %185, %cst_65 [1] : vector<16x32xf32> to vector<16xf32>
    %187 = vector.shape_cast %186 : vector<16xf32> to vector<16x1xf32>
    %cst_66 = arith.constant 3.200000e+01 : f32
    %188 = vector.broadcast %cst_66 : f32 to vector<16x1xf32>
    %189 = arith.divf %187, %188 : vector<16x1xf32>
    %cst_67 = arith.constant 9.99999997E-7 : f32
    %190 = vector.broadcast %cst_67 : f32 to vector<16x1xf32>
    %191 = arith.addf %189, %190 : vector<16x1xf32>
    %192 = math.rsqrt %191 : vector<16x1xf32>
    %193 = vector.broadcast %192 : vector<16x1xf32> to vector<16x32xf32>
    %194 = arith.mulf %183, %193 : vector<16x32xf32>
    %195 = vector.broadcast %184 : vector<1x32xf32> to vector<16x32xf32>
    %196 = arith.mulf %194, %195 : vector<16x32xf32>
    %c296 = arith.constant 296 : index
    %c0_68 = arith.constant 0 : index
    %197 = vector.load %arg4[%c296, %c0_68] : memref<584x128xf32, #tpu.memory_space<vmem>>, vector<32x128xf32>
    %cst_69 = arith.constant dense<0.000000e+00> : vector<16x128xf32>
    %198 = tpu.matmul %196, %197, %cst_69 {dimension_numbers = #tpu.dot_dimension_numbers<[1], [0], [0], [1], [0, 0, 1, 1], [], []>} : vector<16x32xf32>, vector<32x128xf32>, vector<16x128xf32> -> vector<16x128xf32>
    %c328 = arith.constant 328 : index
    %c0_70 = arith.constant 0 : index
    %199 = vector.load %arg4[%c328, %c0_70] : memref<584x128xf32, #tpu.memory_space<vmem>>, vector<1x128xf32>
    %200 = vector.broadcast %199 : vector<1x128xf32> to vector<16x128xf32>
    %201 = arith.addf %198, %200 : vector<16x128xf32>
    %c336 = arith.constant 336 : index
    %c0_71 = arith.constant 0 : index
    %202 = vector.load %arg4[%c336, %c0_71] : memref<584x128xf32, #tpu.memory_space<vmem>>, vector<32x32xf32>
    %c368 = arith.constant 368 : index
    %c0_72 = arith.constant 0 : index
    %203 = vector.load %arg4[%c368, %c0_72] : memref<584x128xf32, #tpu.memory_space<vmem>>, vector<1x32xf32>
    %204 = vector.extract_strided_slice %201 {offsets = [0, 0], sizes = [16, 8], strides = [1, 1]} : vector<16x128xf32> to vector<16x8xf32>
    %205 = vector.extract_strided_slice %201 {offsets = [0, 32], sizes = [16, 8], strides = [1, 1]} : vector<16x128xf32> to vector<16x8xf32>
    %206 = vector.extract_strided_slice %201 {offsets = [0, 64], sizes = [16, 8], strides = [1, 1]} : vector<16x128xf32> to vector<16x8xf32>
    %cst_73 = arith.constant dense<0.000000e+00> : vector<16x16xf32>
    %207 = tpu.matmul %204, %205, %cst_73 {dimension_numbers = #tpu.dot_dimension_numbers<[1], [1], [0], [0], [0, 0, 1, 0], [], []>} : vector<16x8xf32>, vector<16x8xf32>, vector<16x16xf32> -> vector<16x16xf32>
    %cst_74 = arith.constant 0.353553385 : f32
    %208 = vector.broadcast %cst_74 : f32 to vector<16x16xf32>
    %209 = arith.mulf %207, %208 : vector<16x16xf32>
    %210 = arith.addf %209, %44 : vector<16x16xf32>
    %cst_75 = arith.constant dense<0xFF800000> : vector<16xf32>
    %211 = vector.multi_reduction <maximumf>, %210, %cst_75 [1] : vector<16x16xf32> to vector<16xf32>
    %212 = vector.shape_cast %211 : vector<16xf32> to vector<16x1xf32>
    %213 = vector.broadcast %212 : vector<16x1xf32> to vector<16x16xf32>
    %214 = arith.subf %210, %213 : vector<16x16xf32>
    %215 = math.exp %214 : vector<16x16xf32>
    %cst_76 = arith.constant dense<0.000000e+00> : vector<16xf32>
    %216 = vector.multi_reduction <add>, %215, %cst_76 [1] : vector<16x16xf32> to vector<16xf32>
    %217 = vector.shape_cast %216 : vector<16xf32> to vector<16x1xf32>
    %218 = tpu.reciprocal %217 {approx = true} : vector<16x1xf32> -> vector<16x1xf32>
    %219 = vector.broadcast %218 : vector<16x1xf32> to vector<16x16xf32>
    %220 = arith.mulf %215, %219 : vector<16x16xf32>
    %cst_77 = arith.constant dense<0.000000e+00> : vector<16x8xf32>
    %221 = tpu.matmul %220, %206, %cst_77 {dimension_numbers = #tpu.dot_dimension_numbers<[1], [0], [0], [1], [0, 0, 1, 1], [], []>} : vector<16x16xf32>, vector<16x8xf32>, vector<16x8xf32> -> vector<16x8xf32>
    %222 = vector.extract_strided_slice %202 {offsets = [0, 0], sizes = [8, 32], strides = [1, 1]} : vector<32x32xf32> to vector<8x32xf32>
    %cst_78 = arith.constant dense<0.000000e+00> : vector<16x32xf32>
    %223 = tpu.matmul %221, %222, %cst_78 {dimension_numbers = #tpu.dot_dimension_numbers<[1], [0], [0], [1], [0, 0, 1, 1], [], []>} : vector<16x8xf32>, vector<8x32xf32>, vector<16x32xf32> -> vector<16x32xf32>
    %224 = vector.broadcast %203 : vector<1x32xf32> to vector<16x32xf32>
    %225 = arith.addf %224, %223 : vector<16x32xf32>
    %226 = vector.extract_strided_slice %201 {offsets = [0, 8], sizes = [16, 8], strides = [1, 1]} : vector<16x128xf32> to vector<16x8xf32>
    %227 = vector.extract_strided_slice %201 {offsets = [0, 40], sizes = [16, 8], strides = [1, 1]} : vector<16x128xf32> to vector<16x8xf32>
    %228 = vector.extract_strided_slice %201 {offsets = [0, 72], sizes = [16, 8], strides = [1, 1]} : vector<16x128xf32> to vector<16x8xf32>
    %cst_79 = arith.constant dense<0.000000e+00> : vector<16x16xf32>
    %229 = tpu.matmul %226, %227, %cst_79 {dimension_numbers = #tpu.dot_dimension_numbers<[1], [1], [0], [0], [0, 0, 1, 0], [], []>} : vector<16x8xf32>, vector<16x8xf32>, vector<16x16xf32> -> vector<16x16xf32>
    %cst_80 = arith.constant 0.353553385 : f32
    %230 = vector.broadcast %cst_80 : f32 to vector<16x16xf32>
    %231 = arith.mulf %229, %230 : vector<16x16xf32>
    %232 = arith.addf %231, %44 : vector<16x16xf32>
    %cst_81 = arith.constant dense<0xFF800000> : vector<16xf32>
    %233 = vector.multi_reduction <maximumf>, %232, %cst_81 [1] : vector<16x16xf32> to vector<16xf32>
    %234 = vector.shape_cast %233 : vector<16xf32> to vector<16x1xf32>
    %235 = vector.broadcast %234 : vector<16x1xf32> to vector<16x16xf32>
    %236 = arith.subf %232, %235 : vector<16x16xf32>
    %237 = math.exp %236 : vector<16x16xf32>
    %cst_82 = arith.constant dense<0.000000e+00> : vector<16xf32>
    %238 = vector.multi_reduction <add>, %237, %cst_82 [1] : vector<16x16xf32> to vector<16xf32>
    %239 = vector.shape_cast %238 : vector<16xf32> to vector<16x1xf32>
    %240 = tpu.reciprocal %239 {approx = true} : vector<16x1xf32> -> vector<16x1xf32>
    %241 = vector.broadcast %240 : vector<16x1xf32> to vector<16x16xf32>
    %242 = arith.mulf %237, %241 : vector<16x16xf32>
    %cst_83 = arith.constant dense<0.000000e+00> : vector<16x8xf32>
    %243 = tpu.matmul %242, %228, %cst_83 {dimension_numbers = #tpu.dot_dimension_numbers<[1], [0], [0], [1], [0, 0, 1, 1], [], []>} : vector<16x16xf32>, vector<16x8xf32>, vector<16x8xf32> -> vector<16x8xf32>
    %244 = vector.extract_strided_slice %202 {offsets = [8, 0], sizes = [8, 32], strides = [1, 1]} : vector<32x32xf32> to vector<8x32xf32>
    %cst_84 = arith.constant dense<0.000000e+00> : vector<16x32xf32>
    %245 = tpu.matmul %243, %244, %cst_84 {dimension_numbers = #tpu.dot_dimension_numbers<[1], [0], [0], [1], [0, 0, 1, 1], [], []>} : vector<16x8xf32>, vector<8x32xf32>, vector<16x32xf32> -> vector<16x32xf32>
    %246 = arith.addf %225, %245 : vector<16x32xf32>
    %247 = vector.extract_strided_slice %201 {offsets = [0, 16], sizes = [16, 8], strides = [1, 1]} : vector<16x128xf32> to vector<16x8xf32>
    %248 = vector.extract_strided_slice %201 {offsets = [0, 48], sizes = [16, 8], strides = [1, 1]} : vector<16x128xf32> to vector<16x8xf32>
    %249 = vector.extract_strided_slice %201 {offsets = [0, 80], sizes = [16, 8], strides = [1, 1]} : vector<16x128xf32> to vector<16x8xf32>
    %cst_85 = arith.constant dense<0.000000e+00> : vector<16x16xf32>
    %250 = tpu.matmul %247, %248, %cst_85 {dimension_numbers = #tpu.dot_dimension_numbers<[1], [1], [0], [0], [0, 0, 1, 0], [], []>} : vector<16x8xf32>, vector<16x8xf32>, vector<16x16xf32> -> vector<16x16xf32>
    %cst_86 = arith.constant 0.353553385 : f32
    %251 = vector.broadcast %cst_86 : f32 to vector<16x16xf32>
    %252 = arith.mulf %250, %251 : vector<16x16xf32>
    %253 = arith.addf %252, %44 : vector<16x16xf32>
    %cst_87 = arith.constant dense<0xFF800000> : vector<16xf32>
    %254 = vector.multi_reduction <maximumf>, %253, %cst_87 [1] : vector<16x16xf32> to vector<16xf32>
    %255 = vector.shape_cast %254 : vector<16xf32> to vector<16x1xf32>
    %256 = vector.broadcast %255 : vector<16x1xf32> to vector<16x16xf32>
    %257 = arith.subf %253, %256 : vector<16x16xf32>
    %258 = math.exp %257 : vector<16x16xf32>
    %cst_88 = arith.constant dense<0.000000e+00> : vector<16xf32>
    %259 = vector.multi_reduction <add>, %258, %cst_88 [1] : vector<16x16xf32> to vector<16xf32>
    %260 = vector.shape_cast %259 : vector<16xf32> to vector<16x1xf32>
    %261 = tpu.reciprocal %260 {approx = true} : vector<16x1xf32> -> vector<16x1xf32>
    %262 = vector.broadcast %261 : vector<16x1xf32> to vector<16x16xf32>
    %263 = arith.mulf %258, %262 : vector<16x16xf32>
    %cst_89 = arith.constant dense<0.000000e+00> : vector<16x8xf32>
    %264 = tpu.matmul %263, %249, %cst_89 {dimension_numbers = #tpu.dot_dimension_numbers<[1], [0], [0], [1], [0, 0, 1, 1], [], []>} : vector<16x16xf32>, vector<16x8xf32>, vector<16x8xf32> -> vector<16x8xf32>
    %265 = vector.extract_strided_slice %202 {offsets = [16, 0], sizes = [8, 32], strides = [1, 1]} : vector<32x32xf32> to vector<8x32xf32>
    %cst_90 = arith.constant dense<0.000000e+00> : vector<16x32xf32>
    %266 = tpu.matmul %264, %265, %cst_90 {dimension_numbers = #tpu.dot_dimension_numbers<[1], [0], [0], [1], [0, 0, 1, 1], [], []>} : vector<16x8xf32>, vector<8x32xf32>, vector<16x32xf32> -> vector<16x32xf32>
    %267 = arith.addf %246, %266 : vector<16x32xf32>
    %268 = vector.extract_strided_slice %201 {offsets = [0, 24], sizes = [16, 8], strides = [1, 1]} : vector<16x128xf32> to vector<16x8xf32>
    %269 = vector.extract_strided_slice %201 {offsets = [0, 56], sizes = [16, 8], strides = [1, 1]} : vector<16x128xf32> to vector<16x8xf32>
    %270 = vector.extract_strided_slice %201 {offsets = [0, 88], sizes = [16, 8], strides = [1, 1]} : vector<16x128xf32> to vector<16x8xf32>
    %cst_91 = arith.constant dense<0.000000e+00> : vector<16x16xf32>
    %271 = tpu.matmul %268, %269, %cst_91 {dimension_numbers = #tpu.dot_dimension_numbers<[1], [1], [0], [0], [0, 0, 1, 0], [], []>} : vector<16x8xf32>, vector<16x8xf32>, vector<16x16xf32> -> vector<16x16xf32>
    %cst_92 = arith.constant 0.353553385 : f32
    %272 = vector.broadcast %cst_92 : f32 to vector<16x16xf32>
    %273 = arith.mulf %271, %272 : vector<16x16xf32>
    %274 = arith.addf %273, %44 : vector<16x16xf32>
    %cst_93 = arith.constant dense<0xFF800000> : vector<16xf32>
    %275 = vector.multi_reduction <maximumf>, %274, %cst_93 [1] : vector<16x16xf32> to vector<16xf32>
    %276 = vector.shape_cast %275 : vector<16xf32> to vector<16x1xf32>
    %277 = vector.broadcast %276 : vector<16x1xf32> to vector<16x16xf32>
    %278 = arith.subf %274, %277 : vector<16x16xf32>
    %279 = math.exp %278 : vector<16x16xf32>
    %cst_94 = arith.constant dense<0.000000e+00> : vector<16xf32>
    %280 = vector.multi_reduction <add>, %279, %cst_94 [1] : vector<16x16xf32> to vector<16xf32>
    %281 = vector.shape_cast %280 : vector<16xf32> to vector<16x1xf32>
    %282 = tpu.reciprocal %281 {approx = true} : vector<16x1xf32> -> vector<16x1xf32>
    %283 = vector.broadcast %282 : vector<16x1xf32> to vector<16x16xf32>
    %284 = arith.mulf %279, %283 : vector<16x16xf32>
    %cst_95 = arith.constant dense<0.000000e+00> : vector<16x8xf32>
    %285 = tpu.matmul %284, %270, %cst_95 {dimension_numbers = #tpu.dot_dimension_numbers<[1], [0], [0], [1], [0, 0, 1, 1], [], []>} : vector<16x16xf32>, vector<16x8xf32>, vector<16x8xf32> -> vector<16x8xf32>
    %286 = vector.extract_strided_slice %202 {offsets = [24, 0], sizes = [8, 32], strides = [1, 1]} : vector<32x32xf32> to vector<8x32xf32>
    %cst_96 = arith.constant dense<0.000000e+00> : vector<16x32xf32>
    %287 = tpu.matmul %285, %286, %cst_96 {dimension_numbers = #tpu.dot_dimension_numbers<[1], [0], [0], [1], [0, 0, 1, 1], [], []>} : vector<16x8xf32>, vector<8x32xf32>, vector<16x32xf32> -> vector<16x32xf32>
    %288 = arith.addf %267, %287 : vector<16x32xf32>
    %289 = arith.addf %183, %288 : vector<16x32xf32>
    %c376 = arith.constant 376 : index
    %c0_97 = arith.constant 0 : index
    %290 = vector.load %arg4[%c376, %c0_97] : memref<584x128xf32, #tpu.memory_space<vmem>>, vector<1x32xf32>
    %291 = arith.mulf %289, %289 : vector<16x32xf32>
    %cst_98 = arith.constant dense<0.000000e+00> : vector<16xf32>
    %292 = vector.multi_reduction <add>, %291, %cst_98 [1] : vector<16x32xf32> to vector<16xf32>
    %293 = vector.shape_cast %292 : vector<16xf32> to vector<16x1xf32>
    %cst_99 = arith.constant 3.200000e+01 : f32
    %294 = vector.broadcast %cst_99 : f32 to vector<16x1xf32>
    %295 = arith.divf %293, %294 : vector<16x1xf32>
    %cst_100 = arith.constant 9.99999997E-7 : f32
    %296 = vector.broadcast %cst_100 : f32 to vector<16x1xf32>
    %297 = arith.addf %295, %296 : vector<16x1xf32>
    %298 = math.rsqrt %297 : vector<16x1xf32>
    %299 = vector.broadcast %298 : vector<16x1xf32> to vector<16x32xf32>
    %300 = arith.mulf %289, %299 : vector<16x32xf32>
    %301 = vector.broadcast %290 : vector<1x32xf32> to vector<16x32xf32>
    %302 = arith.mulf %300, %301 : vector<16x32xf32>
    %c384 = arith.constant 384 : index
    %c0_101 = arith.constant 0 : index
    %303 = vector.load %arg4[%c384, %c0_101] : memref<584x128xf32, #tpu.memory_space<vmem>>, vector<32x128xf32>
    %cst_102 = arith.constant dense<0.000000e+00> : vector<16x128xf32>
    %304 = tpu.matmul %302, %303, %cst_102 {dimension_numbers = #tpu.dot_dimension_numbers<[1], [0], [0], [1], [0, 0, 1, 1], [], []>} : vector<16x32xf32>, vector<32x128xf32>, vector<16x128xf32> -> vector<16x128xf32>
    %c416 = arith.constant 416 : index
    %c0_103 = arith.constant 0 : index
    %305 = vector.load %arg4[%c416, %c0_103] : memref<584x128xf32, #tpu.memory_space<vmem>>, vector<1x128xf32>
    %306 = vector.broadcast %305 : vector<1x128xf32> to vector<16x128xf32>
    %307 = arith.addf %304, %306 : vector<16x128xf32>
    %308 = vector.extract_strided_slice %307 {offsets = [0, 0], sizes = [16, 64], strides = [1, 1]} : vector<16x128xf32> to vector<16x64xf32>
    %309 = vector.extract_strided_slice %307 {offsets = [0, 64], sizes = [16, 64], strides = [1, 1]} : vector<16x128xf32> to vector<16x64xf32>
    %310 = arith.negf %308 : vector<16x64xf32>
    %311 = math.exp %310 : vector<16x64xf32>
    %cst_104 = arith.constant 1.000000e+00 : f32
    %312 = vector.broadcast %cst_104 : f32 to vector<16x64xf32>
    %313 = arith.addf %312, %311 : vector<16x64xf32>
    %314 = arith.divf %312, %313 : vector<16x64xf32>
    %315 = arith.mulf %308, %314 : vector<16x64xf32>
    %316 = arith.mulf %315, %309 : vector<16x64xf32>
    %c424 = arith.constant 424 : index
    %c0_105 = arith.constant 0 : index
    %317 = vector.load %arg4[%c424, %c0_105] : memref<584x128xf32, #tpu.memory_space<vmem>>, vector<64x32xf32>
    %cst_106 = arith.constant dense<0.000000e+00> : vector<16x32xf32>
    %318 = tpu.matmul %316, %317, %cst_106 {dimension_numbers = #tpu.dot_dimension_numbers<[1], [0], [0], [1], [0, 0, 1, 1], [], []>} : vector<16x64xf32>, vector<64x32xf32>, vector<16x32xf32> -> vector<16x32xf32>
    %319 = arith.addf %289, %318 : vector<16x32xf32>
    %c488 = arith.constant 488 : index
    %c0_107 = arith.constant 0 : index
    %320 = vector.load %arg4[%c488, %c0_107] : memref<584x128xf32, #tpu.memory_space<vmem>>, vector<1x32xf32>
    %321 = vector.broadcast %320 : vector<1x32xf32> to vector<16x32xf32>
    %322 = arith.addf %319, %321 : vector<16x32xf32>
    %323 = vector.shape_cast %322 : vector<16x32xf32> to vector<2x8x32xf32>
    %324 = vector.extract_strided_slice %323 {offsets = [0, 0, 0], sizes = [2, 1, 32], strides = [1, 1, 1]} : vector<2x8x32xf32> to vector<2x1x32xf32>
    %325 = vector.shape_cast %324 : vector<2x1x32xf32> to vector<2x32xf32>
    %c496 = arith.constant 496 : index
    %c0_108 = arith.constant 0 : index
    %326 = vector.load %arg4[%c496, %c0_108] : memref<584x128xf32, #tpu.memory_space<vmem>>, vector<1x32xf32>
    %327 = arith.mulf %325, %325 : vector<2x32xf32>
    %cst_109 = arith.constant dense<0.000000e+00> : vector<2xf32>
    %328 = vector.multi_reduction <add>, %327, %cst_109 [1] : vector<2x32xf32> to vector<2xf32>
    %329 = vector.shape_cast %328 : vector<2xf32> to vector<2x1xf32>
    %cst_110 = arith.constant 3.200000e+01 : f32
    %330 = vector.broadcast %cst_110 : f32 to vector<2x1xf32>
    %331 = arith.divf %329, %330 : vector<2x1xf32>
    %cst_111 = arith.constant 9.99999997E-7 : f32
    %332 = vector.broadcast %cst_111 : f32 to vector<2x1xf32>
    %333 = arith.addf %331, %332 : vector<2x1xf32>
    %334 = math.rsqrt %333 : vector<2x1xf32>
    %335 = vector.broadcast %334 : vector<2x1xf32> to vector<2x32xf32>
    %336 = arith.mulf %325, %335 : vector<2x32xf32>
    %337 = vector.broadcast %326 : vector<1x32xf32> to vector<2x32xf32>
    %338 = arith.mulf %336, %337 : vector<2x32xf32>
    %c504 = arith.constant 504 : index
    %c0_112 = arith.constant 0 : index
    %339 = vector.load %arg4[%c504, %c0_112] : memref<584x128xf32, #tpu.memory_space<vmem>>, vector<32x32xf32>
    %cst_113 = arith.constant dense<0.000000e+00> : vector<2x32xf32>
    %340 = tpu.matmul %338, %339, %cst_113 {dimension_numbers = #tpu.dot_dimension_numbers<[1], [0], [0], [1], [0, 0, 1, 1], [], []>} : vector<2x32xf32>, vector<32x32xf32>, vector<2x32xf32> -> vector<2x32xf32>
    %c536 = arith.constant 536 : index
    %c0_114 = arith.constant 0 : index
    %341 = vector.load %arg4[%c536, %c0_114] : memref<584x128xf32, #tpu.memory_space<vmem>>, vector<1x32xf32>
    %342 = vector.broadcast %341 : vector<1x32xf32> to vector<2x32xf32>
    %343 = arith.addf %340, %342 : vector<2x32xf32>
    %cst_115 = arith.constant 0.000000e+00 : f32
    %344 = vector.broadcast %cst_115 : f32 to vector<2x32xf32>
    %345 = arith.maximumf %343, %344 : vector<2x32xf32>
    %c544 = arith.constant 544 : index
    %c0_116 = arith.constant 0 : index
    %346 = vector.load %arg4[%c544, %c0_116] : memref<584x128xf32, #tpu.memory_space<vmem>>, vector<32x8xf32>
    %cst_117 = arith.constant dense<0.000000e+00> : vector<2x8xf32>
    %347 = tpu.matmul %345, %346, %cst_117 {dimension_numbers = #tpu.dot_dimension_numbers<[1], [0], [0], [1], [0, 0, 1, 1], [], []>} : vector<2x32xf32>, vector<32x8xf32>, vector<2x8xf32> -> vector<2x8xf32>
    %c576 = arith.constant 576 : index
    %c0_118 = arith.constant 0 : index
    %348 = vector.load %arg4[%c576, %c0_118] : memref<584x128xf32, #tpu.memory_space<vmem>>, vector<1x8xf32>
    %349 = vector.broadcast %348 : vector<1x8xf32> to vector<2x8xf32>
    %350 = arith.addf %347, %349 : vector<2x8xf32>
    %c0_119 = arith.constant 0 : index
    %c0_120 = arith.constant 0 : index
    %351 = vector.load %arg5[%c0_119, %c0_120] : memref<2x8xf32, #tpu.memory_space<vmem>>, vector<2x8xf32>
    tpu.vector_store %arg5[%c0_119, %c0_120], %350 {strides = array<i32>} : memref<2x8xf32, #tpu.memory_space<vmem>>, vector<2x8xf32>,
    return
  }
}

</mosaic_0001>

<bundles_post_ra>
// kernel: model_forward.1
= control target key start
LH: loop header
LB: loop body
LE: loop exit
PB: predicated region body
PF: predicated region fallthrough
CT: control target
= control target key end

     0   :  { %10 = vsyncpa [#allocation3], 0  ;;  %s5060_s0 = inlined_call_operand.vmem [shape: s32[2,4], index: 0, kind: input, shape index: {}]   ;;  %s5061_s1 = inlined_call_operand.hbm [shape: s32[2,4], index: 1, kind: input, shape index: {}]   ;;  %s5062_s2 = inlined_call_operand.vmem [shape: f32[2,4,16], index: 2, kind: input, shape index: {}]   ;;  %s5063_s3 = inlined_call_operand.hbm [shape: f32[2,4,16], index: 3, kind: input, shape index: {}]   ;;  %s5064_s4 = inlined_call_operand.hbm [shape: f32[584,128], index: 4, kind: input, shape index: {}]   ;;  %s5065_s5 = inlined_call_operand.hbm [shape: f32[2,8], index: 5, kind: output, shape index: {}]  }
   0x1   :  { %11 = vsyncpa [#allocation6], 0 }
   0x2   :  { %12 = vsyncpa [#allocation4], 0  ;;  %s4633_s18 = smov [#allocation5]   ;;  %s4539_s22 = scalar_lea.hbm %s5063_s3, 128 }
   0x3   :  { %s32_s19 = sshll.u32 %s4633_s18, 4  ;;  %p4540_p0 = scmp.ne.s32.totalorder %s5063_s3, %s4539_s22  ;;  %s33_s19 = int_to_ptr.vmem [resolvable:$true] %s32_s19 }
   0x4   :  { %p4543_p1 = scmp.lt.u32.totalorder %s4539_s22, %s5063_s3 }
   0x6   :  { %p4545_p2 = pnand %p4543_p1, %p4540_p0 }
   0x8   :  { %4548 = shalt.err (!%p4545_p2)
}
   0x9   :  { %s4549_s27 = scalar_lea.vmem %s33_s19, 128  ;;  %p4554_p4 = scmp.lt.s32.totalorder %s33_s19, %s33_s19 }
   0xa   :  { %p4550_p3 = scmp.ne.s32.totalorder %s33_s19, %s4549_s27  ;;  %p4555_p5 = scmp.lt.s32.totalorder %s4549_s27, %s4549_s27 }
   0xc   :  { %p4556_p6 = por %p4555_p5, %p4554_p4 }
   0xe   :  { %p4557_p7 = pnand %p4556_p6, %p4550_p3 }
  0x10   :  { %4560 = shalt.err (!%p4557_p7)
}
  0x11   :  { %s4634_s28 = smov 64   ;;  %s4635_s29 = smov 4  }
  0x12   :  { %38 = dma.hbm_to_vmem [thread:$0]  %s5063_s3, 128, %s33_s19, [#allocation6], %s4634_s28, %s4634_s28, %s4635_s29  }
  0x13   :  { %s4636_s7 = smov [#allocation2]   ;;  %s4637_s9 = smov [#allocation7]  }
  0x14   :  { %s21_s8 = sshll.u32 %s4636_s7, 4  ;;  %s44_s10 = sshll.u32 %s4637_s9, 4  ;;  %s22_s8 = int_to_ptr.vmem [resolvable:$true] %s21_s8  ;;  %s45_s10 = int_to_ptr.vmem [resolvable:$true] %s44_s10 }
  0x15   :  { %s4561_s13 = scalar_lea.hbm %s5061_s1, 32 }
  0x16   :  { %p4562_p8 = scmp.ne.s32.totalorder %s5061_s1, %s4561_s13  ;;  %p4565_p9 = scmp.lt.u32.totalorder %s4561_s13, %s5061_s1 }
  0x18   :  { %p4567_p10 = pnand %p4565_p9, %p4562_p8 }
  0x1a   :  { %4570 = shalt.err (!%p4567_p10)
}
  0x1b   :  { %s4571_s3 = scalar_lea.vmem %s22_s8, 32  ;;  %p4576_p12 = scmp.lt.s32.totalorder %s22_s8, %s22_s8 }
  0x1c   :  { %p4572_p11 = scmp.ne.s32.totalorder %s22_s8, %s4571_s3  ;;  %p4577_p13 = scmp.lt.s32.totalorder %s4571_s3, %s4571_s3 }
  0x1e   :  { %p4578_p0 = por %p4577_p13, %p4576_p12 }
  0x20   :  { %p4579_p1 = pnand %p4578_p0, %p4572_p11 }
  0x22   :  { %4582 = shalt.err (!%p4579_p1)
}
  0x23   :  { %24 = dma.hbm_to_vmem [thread:$0]  %s5061_s1, 32, %s22_s8, [#allocation3]  }
  0x24   :  { %s4583_s22 = scalar_lea.hbm %s5064_s4, 9344 }
  0x25   :  { %p4584_p2 = scmp.ne.s32.totalorder %s5064_s4, %s4583_s22  ;;  %p4587_p3 = scmp.lt.u32.totalorder %s4583_s22, %s5064_s4 }
  0x27   :  { %p4589_p4 = pnand %p4587_p3, %p4584_p2 }
  0x29   :  { %4592 = shalt.err (!%p4589_p4)
}
  0x2a   :  { %s4593_s27 = scalar_lea.vmem %s45_s10, 9344  ;;  %p4598_p6 = scmp.lt.s32.totalorder %s45_s10, %s45_s10 }
  0x2b   :  { %p4594_p5 = scmp.ne.s32.totalorder %s45_s10, %s4593_s27  ;;  %p4599_p7 = scmp.lt.s32.totalorder %s4593_s27, %s4593_s27 }
  0x2d   :  { %p4600_p8 = por %p4599_p7, %p4598_p6 }
  0x2f   :  { %p4601_p9 = pnand %p4600_p8, %p4594_p5 }
  0x31   :  { %4604 = shalt.err (!%p4601_p9)
}
  0x32   :  { %s4638_s1 = smov 128   ;;  %s4639_s30 = smov 8  }
  0x33   :  { %50 = dma.hbm_to_vmem [thread:$0]  %s5064_s4, 9344, %s45_s10, [#allocation6], %s4638_s1, %s4638_s1, %s4639_s30  }
  0x34   :  { %4627 = dma.done.wait [#allocation3], 32  }
  0x35   :  { %4628 = vsyncadd [#allocation3], 4294967264 }
  0x36   :  { %4629 = dma.done.wait [#allocation6], 9472  }
  0x37   :  { %4630 = vsyncadd [#allocation6], 4294957824  ;;  %v67_v0 = vlaneseq  ;;  %v61_v7 = vld [vmem:[#allocation2] sm:$0x3]  ;;  %v106_v12 = vld [vmem:[#allocation7 + $0x18] sm:$0xff]  ;;  %vm100_vm2 = vcmask 1043456  }
  0x38   :  { %v62_v9 = vadd.s32 3000, %v61_v7  ;;  %v105_v11 = vld [vmem:[#allocation7 + $0x10] sm:$0xff]  ;;  %v103_v14 = vld [vmem:[#allocation7] sm:$0xff]  ;;  %v104_v15 = vld [vmem:[#allocation7 + $0x8] sm:$0xff]  ;;  %vm107_vm3 = vcmask 130048   ;;  %vm65_vm4 = vcmask 31744  }
  0x39   :  { %v71_v1 = vshrl.u32 %v67_v0, 7  ;;  %v68_v2 = vand.u32 127, %v67_v0  ;;  %v4149_v13 = vpack.c.bf16 %v106_v12, %v105_v11  ;;  %v4153_v16 = vpack.c.bf16 %v104_v15, %v103_v14  ;;  %v92_v17 = vld [vmem:[#allocation5] sm:$0xf]  ;;  %v93_v19 = vld [vmem:[#allocation5 + $0x4] sm:$0xf] }
  0x3a   :  { %63 = vrot.lane.b32.xlu0 %v62_v9, %s4635_s29  ;;  %v96_v18 = vrot.slane %v92_v17, 4  ;;  %v90_v20 = vld [vmem:[%s5062_s2] sm:$0xf]  ;;  %v97_v21 = vrot.slane %v93_v19, 4  ;;  %v91_v23 = vld [vmem:[%s5062_s2 + $0x4] sm:$0xf] }
  0x3b   :  { %v372_v3 = vadd.s32 8, %v71_v1  ;;  %v373_v4 = vshra.s32 %v71_v1, 3  ;;  %v375_v5 = vshra.s32 %v68_v2, 3  ;;  %4150 = vmatprep.subr.bf16.mxu1 %v4149_v13  ;;  %4154 = vmatprep.subr.bf16.mxu0 %v4153_v16  ;;  %v60_v25 = vld [vmem:[%s5060_s0] sm:$0x3]  ;;  %v79_v26 = vsub.s32 1, %v71_v1 }
  0x3c   :  { %4152 = vmatpush3.bf16.msra.mxu1 %v4149_v13  ;;  %4156 = vmatpush3.bf16.msra.mxu0 %v4153_v16  ;;  %v101_v22 = vsel %vm100_vm2, %v90_v20, %v96_v18  ;;  %v102_v24 = vsel %vm100_vm2, %v91_v23, %v97_v21  ;;  %v72_v27 = vsub.s32 0, %v71_v1  ;;  %v69_v32 = vsub.s32 15, %v68_v2  ;;  %v279_v41 = vld [vmem:[#allocation7 + $0x28] sm:$0xff]  ;;  %v280_v42 = vld [vmem:[#allocation7 + $0x30] sm:$0xff]  ;;  %v281_v46 = vld [vmem:[#allocation7 + $0x38] sm:$0xff]  ;;  %s4640_s0 = smov 96  }
  0x3d   :  { %v374_v6 = vshra.s32 %v372_v3, 3  ;;  %vm4724_vm0 = vcmp.eq.s32.totalorder %v373_v4, %v375_v5  ;;  %3872 = vmatprep.mubr.msk.f32.mxu1 %vm107_vm3, %v101_v22  ;;  %v4157_v44 = vpack.c.bf16 %v280_v42, %v279_v41  ;;  %v282_v47 = vld [vmem:[#allocation7 + $0x40] sm:$0xff]  ;;  %vm288_vm5 = vcmask 261120   ;;  %v3612_v58 = vld [vmem:[#allocation7 + $0x48] ss:$0 sm:$0xff]  ;;  %v404_v3 = vld [vmem:[#allocation7 + $0x58] sm:$0xff] }
  0x3e   :  { %v4161_v48 = vpack.c.bf16 %v282_v47, %v281_v46  ;;  %v3611_v50 = vld [vmem:[#allocation7 + $0x20] ss:$0 sm:$0xff]  ;;  %v407_v7 = vld [vmem:[#allocation7 + $0x70] sm:$0xff]  ;;  %vm505_vm6 = vcmask 64512   ;;  %s4641_s2 = smov 88   ;;  %s4642_s12 = smov 120  }
  0x3f   :  { %vm4728_vm1 = vcmp.eq.s32.totalorder %v374_v6, %v375_v5  ;;  %3873 = vmatmul.mubr.msk.f32.vlgmr.msra.gmra.mrb[0].mxu1 %vm107_vm3, %v102_v24  ;;  %4158 = vmatprep.subr.bf16.mxu1 %v4157_v44  ;;  %v405_v4 = vld [vmem:[#allocation7 + $0x60] sm:$0xff]  ;;  %v406_v5 = vld [vmem:[#allocation7 + $0x68] sm:$0xff]  ;;  %v3615_v19 = vld [vmem:[#allocation7 + $0x50] ss:$0 sm:$0xff]  ;;  %s4643_s13 = smov 80   ;;  %s4644_s14 = smov 112  }
  0x40   :  { %4160 = vmatpush3.bf16.msra.mxu1 %v4157_v44  ;;  %v4165_v6 = vpack.c.bf16 %v405_v4, %v404_v3  ;;  %v4169_v9 = vpack.c.bf16 %v407_v7, %v406_v5  ;;  %v3616_v24 = vld [vmem:[#allocation7 + $0x78] ss:$0 sm:$0xff]  ;;  %vm4786_vm7 = vmpackc.low %vm505_vm6, %vm505_vm6  ;;  %s4646_s15 = smov 72   ;;  %s4647_s16 = smov 104   ;;  %vm1797_vm8 = vcmask 523264   ;;  %vm3399_vm9 = vcmask 1041409  }
  0x41   :  { %4162 = vmatprep.subr.bf16.mxu1 %v4161_v48  ;;  %s4648_s17 = smov 56   ;;  %s4649_s3 = smov 48   ;;  %vm3402_vm10 = vcmask 254976   ;;  %vm4652_vm11 = vmmov 0   ;;  %vm3589_vm12 = vcmask 58368  }
  0x42   :  { %4166 = vmatprep.subr.bf16.mxu0 %v4165_v6  ;;  %s4650_s18 = smov 40  }
  0x44   :  { %4164 = vmatpush3.bf16.msra.mxu1 %v4161_v48 }
  0xac   :  { %v64_v28 = vpop.permute.xlu0 %63 }
  0xad   :  { %v66_v29 = vsel %vm65_vm4, %v60_v25, %v64_v28 }
  0xae   :  { %v80_v30 = vrot.slane %v66_v29, %v79_v26  ;;  %v73_v31 = vrot.slane %v66_v29, %v72_v27 }
  0xb0   :  { %82 = vbcast.lane.b32.xlu1 %v80_v30, 256  ;;  %75 = vbcast.lane.b32.xlu0 %v73_v31, 256 }
 0x112   :  { %v3874_v43 = vpop.f32.mrb[0].mxu1 }
 0x113   :  { %v180_v45 = vpop.f32.mrb[1].mxu1 }
 0x122   :  { %v83_v33 = vpop.permute.xlu1 %82  ;;  %v76_v34 = vpop.permute.xlu0 %75 }
 0x123   :  { %v85_v35 = vshra.s32 %v83_v33, %v69_v32  ;;  %v84_v36 = vshra.s32 %v76_v34, %v69_v32 }
 0x125   :  { %v87_v37 = vand.u32 1, %v85_v35  ;;  %v86_v38 = vand.u32 1, %v84_v36  ;;  %v4645_v36 = vmov -1e+30  }
 0x126   :  { %v4802_v41 = vsel %vm4728_vm1, 0.0, %v4645_v36 }
 0x127   :  { %v89_v39 = vcvt.s32.f32 %v87_v37  ;;  %v88_v40 = vcvt.s32.f32 %v86_v38  ;;  %v4798_v37 = vsel %vm4724_vm0, 0.0, %v4645_v36 }
 0x129   :  { %3879 = vmatprep.mubr.msk.f32.mxu0 %vm107_vm3, %v88_v40 }
 0x12a   :  { %3880 = vmatmul.mubr.msk.f32.vlgmr.msra.gmra.mrb[0].mxu0 %vm107_vm3, %v89_v39 }
 0x12b   :  { %4168 = vmatpush3.bf16.msra.mxu0 %v4165_v6 }
 0x12c   :  { %4170 = vmatprep.subr.bf16.mxu0 %v4169_v9 }
 0x12f   :  { %4172 = vmatpush3.bf16.msra.mxu0 %v4169_v9 }
 0x1fd   :  { %v3881_v49 = vpop.f32.mrb[0].mxu0 }
 0x1fe   :  { %v267_v51 = vadd.f32 %v3881_v49, %v3874_v43  ;;  %v261_v52 = vpop.f32.mrb[1].mxu0 }
 0x1ff   :  { %v262_v53 = vadd.f32 %v261_v52, %v180_v45 }
 0x200   :  { %v276_v54 = vadd.f32 %v3611_v50, %v267_v51 }
 0x201   :  { %v275_v55 = vadd.f32 %v3611_v50, %v262_v53 }
 0x202   :  { %v278_v57 = vmax.f32 %v276_v54, 0.0 }
 0x203   :  { %v277_v56 = vmax.f32 %v275_v55, 0.0 }
 0x205   :  { %3890 = vmatprep.mubr.msk.f32.mxu1 %vm288_vm5, %v277_v56 }
 0x206   :  { %3891 = vmatmul.mubr.msk.f32.vlgmr.msra.gmra.mrb[2].mxu1 %vm288_vm5, %v278_v57 }
 0x2d9   :  { %v3892_v59 = vpop.f32.mrb[2].mxu1 }
 0x2da   :  { %v4748_v60 = vadd.f32 %v3892_v59, %v3612_v58  ;;  %v361_v61 = vpop.f32.mrb[3].mxu1 }
 0x2db   :  { %v4750_v62 = vadd.f32 %v3612_v58, %v361_v61 }
 0x2dc   :  { %v382_v63 = vmul.f32 %v4748_v60, %v4748_v60 }
 0x2dd   :  { %v381_v0 = vmul.f32 %v4750_v62, %v4750_v62 }
 0x2de   :  { %v386_v1 = vsel %vm288_vm5, %v382_v63, 0.0 }
 0x2df   :  { %387 = vadd.xlane.f32.xlu0 %v386_v1  ;;  %v383_v2 = vsel %vm288_vm5, %v381_v0, 0.0 }
 0x2e0   :  { %384 = vadd.xlane.f32.xlu1 %v383_v2 }
 0x36c   :  { %v388_v11 = vpop.xlane.xlu0 %387 }
 0x36d   :  { %v391_v12 = vmul.f32 0.03125, %v388_v11  ;;  %v385_v13 = vpop.xlane.xlu1 %384 }
 0x36e   :  { %v390_v14 = vmul.f32 0.03125, %v385_v13 }
 0x36f   :  { %v393_v15 = vadd.f32 1e-06, %v391_v12 }
 0x370   :  { %v392_v16 = vadd.f32 1e-06, %v390_v14 }
 0x371   :  { %4441 = vrsqrt.f32 %v393_v15 }
 0x372   :  { %4443 = vrsqrt.f32 %v392_v16  ;;  %v494_v16 = vld [vmem:[#allocation7 + $0x80] sm:$0xff] }
 0x37b   :  { %v4442_v17 = vpop.eup %4441 }
 0x37c   :  { %v4444_v18 = vpop.eup %4443  ;;  %v397_v20 = vmul.f32 %v4442_v17, %v4748_v60 }
 0x37d   :  { %v396_v21 = vmul.f32 %v4444_v18, %v4750_v62 }
 0x37e   :  { %v403_v23 = vmul.f32 %v3615_v19, %v397_v20 }
 0x37f   :  { %v402_v22 = vmul.f32 %v3615_v19, %v396_v21 }
 0x381   :  { %3901 = vmatprep.mubr.msk.f32.mxu0 %vm288_vm5, %v402_v22 }
 0x382   :  { %3902 = vmatmul.mubr.msk.f32.vlgmr.msra.gmra.mrb[2].mxu0 %vm288_vm5, %v403_v23 }
 0x455   :  { %v3903_v25 = vpop.f32.mrb[2].mxu0 }
 0x456   :  { %v4762_v26 = vadd.f32 %v3903_v25, %v3616_v24  ;;  %v485_v27 = vpop.f32.mrb[3].mxu0 }
 0x457   :  { %v4764_v28 = vadd.f32 %v3616_v24, %v485_v27 }
 0x459   :  { %3908 = vmatprep.mubr.msk.f32.mxu1 %vm505_vm6, %v4764_v28  ;;  %v4770_v29 = vpack.i.bf16 %v4762_v26, %v4764_v28 }
 0x45b   :  { %4362 = vrot.lane.b32.xlu0 %v4770_v29, %s4640_s0 }
 0x45f   :  { %4372 = vrot.lane.b32.xlu0 %v4770_v29, %s4641_s2 }
 0x463   :  { %789 = vrot.lane.b32.xlu0 %v4764_v28, %s4642_s12 }
 0x467   :  { %791 = vrot.lane.b32.xlu0 %v4762_v26, %s4642_s12 }
 0x46b   :  { %4377 = vrot.lane.b32.xlu0 %v4770_v29, %s4643_s13 }
 0x46f   :  { %1078 = vrot.lane.b32.xlu0 %v4762_v26, %s4644_s14 }
 0x4cd   :  { %v4363_v30 = vpop.permute.xlu0 %4362 }
 0x4ce   :  { %v4365_v31 = vunpack.i.h.bf16 %v4363_v30  ;;  %v4364_v32 = vunpack.i.l.bf16 %v4363_v30 }
 0x4d0   :  { %v4173_v34 = vpack.c.bf16 %v4365_v31, %v4364_v32 }
 0x4d1   :  { %v4373_v54 = vpop.permute.xlu0 %4372 }
 0x4d2   :  { %4175 = vmatprep.subr.msk.bf16.mxu1 %vm4786_vm7, %v4173_v34  ;;  %v4375_v59 = vunpack.i.h.bf16 %v4373_v54  ;;  %v4374_v61 = vunpack.i.l.bf16 %v4373_v54 }
 0x4d3   :  { %4178 = vmatpush3.bf16.xpose.msk.msra.mxu1 %vm4786_vm7, %v4173_v34 }
 0x4d4   :  { %v4183_v3 = vpack.c.bf16 %v4375_v59, %v4374_v61  ;;  %3918 = vmatprep.subr.mxu1 %v494_v16 }
 0x4d5   :  { %v790_v56 = vpop.permute.xlu0 %789 }
 0x4d9   :  { %v792_v63 = vpop.permute.xlu0 %791 }
 0x4da   :  { %3909 = vmatmul.mubr.msk.f32.vlgmr.msra.gmra.mrb[4].mxu1 %vm505_vm6, %v4762_v26 }
 0x4db   :  { %3919 = vmatpush3.msra.mxu1 %v494_v16 }
 0x4dd   :  { %v4378_v6 = vpop.permute.xlu0 %4377 }
 0x4de   :  { %v4380_v11 = vunpack.i.h.bf16 %v4378_v6  ;;  %v4379_v12 = vunpack.i.l.bf16 %v4378_v6 }
 0x4e0   :  { %v4193_v13 = vpack.c.bf16 %v4380_v11, %v4379_v12 }
 0x4e1   :  { %v1079_v15 = vpop.permute.xlu0 %1078 }
 0x5ad   :  { %v3910_v35 = vpop.f32.mrb[4].mxu1 }
 0x5ae   :  { %v580_v38 = vpop.f32.mrb[5].mxu1  ;;  %v590_v39 = vmul.f32 0.35355338, %v3910_v35 }
 0x5af   :  { %v589_v40 = vmul.f32 0.35355338, %v580_v38 }
 0x5b0   :  { %v592_v44 = vadd.f32 %v590_v39, %v4802_v41 }
 0x5b1   :  { %v591_v42 = vadd.f32 %v589_v40, %v4798_v37 }
 0x5b2   :  { %v596_v45 = vsel %vm107_vm3, %v592_v44, -inf }
 0x5b3   :  { %v593_v43 = vsel %vm107_vm3, %v591_v42, -inf }
 0x5b4   :  { %594 = vmax.xlane.f32.xlu1 %v593_v43 }
 0x5b8   :  { %597 = vmax.xlane.f32.xlu1 %v596_v45 }
 0x641   :  { %v595_v8 = vpop.xlane.xlu1 %594 }
 0x642   :  { %v599_v46 = vsub.f32 %v591_v42, %v595_v8 }
 0x644   :  { %v601_v49 = vmul.f32 1.442695, %v599_v46 }
 0x645   :  { %v598_v47 = vpop.xlane.xlu1 %597 }
 0x646   :  { %v600_v48 = vsub.f32 %v592_v44, %v598_v47 }
 0x648   :  { %v603_v50 = vmul.f32 1.442695, %v600_v48 }
 0x64a   :  { %4445 = vpow2.f32 %v603_v50 }
 0x64b   :  { %4447 = vpow2.f32 %v601_v49 }
 0x654   :  { %v4446_v10 = vpop.eup %4445 }
 0x655   :  { %v608_v51 = vsel %vm107_vm3, %v4446_v10, 0.0  ;;  %v4448_v52 = vpop.eup %4447 }
 0x656   :  { %609 = vadd.xlane.f32.xlu1 %v608_v51  ;;  %v605_v53 = vsel %vm107_vm3, %v4448_v52, 0.0 }
 0x65a   :  { %606 = vadd.xlane.f32.xlu1 %v605_v53 }
 0x66b   :  { %4367 = vrot.lane.b32.xlu1 %v4770_v29, %s4634_s28 }
 0x66f   :  { %1076 = vrot.lane.b32.xlu1 %v4764_v28, %s4644_s14 }
 0x6e3   :  { %v610_v55 = vpop.xlane.xlu1 %609 }
 0x6e4   :  { %4449 = vrcp.f32 %v610_v55 }
 0x6e7   :  { %v607_v57 = vpop.xlane.xlu1 %606 }
 0x6e8   :  { %4451 = vrcp.f32 %v607_v57 }
 0x6eb   :  { %v4368_v58 = vpop.permute.xlu1 %4367 }
 0x6ec   :  { %v4370_v0 = vunpack.i.h.bf16 %v4368_v58  ;;  %v4369_v1 = vunpack.i.l.bf16 %v4368_v58 }
 0x6ee   :  { %v4179_v2 = vpack.c.bf16 %v4370_v0, %v4369_v1  ;;  %v4450_v4 = vpop.eup %4449 }
 0x6ef   :  { %v614_v9 = vmul.f32 %v4450_v4, %v4446_v10  ;;  %v1077_v14 = vpop.permute.xlu1 %1076 }
 0x6f0   :  { %4180 = vmatprep.subr.bf16.mxu0 %v4179_v2 }
 0x6f1   :  { %4182 = vmatpush3.bf16.msra.mxu0 %v4179_v2 }
 0x6f2   :  { %v4452_v5 = vpop.eup %4451  ;;  %4185 = vmatprep.subr.msk.bf16.mxu0 %vm4786_vm7, %v4183_v3 }
 0x6f3   :  { %v613_v7 = vmul.f32 %v4452_v5, %v4448_v52 }
 0x6f5   :  { %3915 = vmatprep.mubr.msk.f32.mxu0 %vm107_vm3, %v613_v7 }
 0x6f6   :  { %3916 = vmatmul.mubr.msk.f32.vlgmr.msra.gmra.mrb[4].mxu0 %vm107_vm3, %v614_v9 }
 0x6f7   :  { %3927 = vmatprep.mubr.msk.f32.mxu0 %vm505_vm6, %v790_v56 }
 0x6fa   :  { %4188 = vmatpush3.bf16.xpose.msk.msra.mxu0 %vm4786_vm7, %v4183_v3 }
 0x6fb   :  { %4195 = vmatprep.subr.msk.bf16.mxu0 %vm4786_vm7, %v4193_v13 }
 0x701   :  { %3928 = vmatmul.mubr.msk.f32.vlgmr.msra.gmra.mrb[6].mxu0 %vm505_vm6, %v792_v63 }
 0x702   :  { %4198 = vmatpush3.bf16.xpose.msk.msra.mxu0 %vm4786_vm7, %v4193_v13  ;;  %3946 = vmatprep.mubr.msk.f32.mxu0 %vm505_vm6, %v1077_v14  ;;  %v495_v13 = vld [vmem:[#allocation7 + $0x88] sm:$0xff] }
 0x709   :  { %3947 = vmatmul.mubr.msk.f32.vlgmr.msra.gmra.mrb[8].mxu0 %vm505_vm6, %v1079_v15 }
 0x7c9   :  { %v3917_v17 = vpop.f32.mrb[4].mxu0 }
 0x7ca   :  { %v693_v18 = vpop.f32.mrb[5].mxu0 }
 0x7cb   :  { %3920 = vmatprep.mubr.msk.f32.mxu1 %vm505_vm6, %v693_v18 }
 0x7cc   :  { %3921 = vmatmul.mubr.msk.f32.vlgmr.msra.gmra.mrb[6].mxu1 %vm505_vm6, %v3917_v17 }
 0x7d4   :  { %v3929_v19 = vpop.f32.mrb[6].mxu0 }
 0x7d5   :  { %v881_v20 = vmul.f32 0.35355338, %v3929_v19  ;;  %v871_v21 = vpop.f32.mrb[7].mxu0 }
 0x7d6   :  { %v880_v22 = vmul.f32 0.35355338, %v871_v21 }
 0x7d7   :  { %v883_v23 = vadd.f32 %v881_v20, %v4802_v41 }
 0x7d8   :  { %v882_v24 = vadd.f32 %v880_v22, %v4798_v37 }
 0x7d9   :  { %v887_v25 = vsel %vm107_vm3, %v883_v23, -inf }
 0x7da   :  { %888 = vmax.xlane.f32.xlu0 %v887_v25  ;;  %v884_v27 = vsel %vm107_vm3, %v882_v24, -inf }
 0x7db   :  { %885 = vmax.xlane.f32.xlu1 %v884_v27 }
 0x7dc   :  { %v3948_v30 = vpop.f32.mrb[8].mxu0 }
 0x7dd   :  { %v1158_v31 = vpop.f32.mrb[9].mxu0  ;;  %v1168_v8 = vmul.f32 0.35355338, %v3948_v30 }
 0x7de   :  { %v1167_v45 = vmul.f32 0.35355338, %v1158_v31 }
 0x7df   :  { %v1170_v47 = vadd.f32 %v1168_v8, %v4802_v41 }
 0x7e0   :  { %v1169_v46 = vadd.f32 %v1167_v45, %v4798_v37 }
 0x7e1   :  { %v1174_v49 = vsel %vm107_vm3, %v1170_v47, -inf }
 0x7e2   :  { %v1171_v48 = vsel %vm107_vm3, %v1169_v46, -inf }
 0x867   :  { %v889_v32 = vpop.xlane.xlu0 %888 }
 0x868   :  { %v891_v34 = vsub.f32 %v883_v23, %v889_v32  ;;  %v886_v35 = vpop.xlane.xlu1 %885 }
 0x869   :  { %v890_v36 = vsub.f32 %v882_v24, %v886_v35 }
 0x86a   :  { %v894_v38 = vmul.f32 1.442695, %v891_v34 }
 0x86b   :  { %v892_v39 = vmul.f32 1.442695, %v890_v36 }
 0x86c   :  { %4453 = vpow2.f32 %v894_v38 }
 0x86d   :  { %4455 = vpow2.f32 %v892_v39  ;;  %v496_v39 = vld [vmem:[#allocation7 + $0x90] sm:$0xff] }
 0x876   :  { %v4454_v40 = vpop.eup %4453 }
 0x877   :  { %v4456_v42 = vpop.eup %4455  ;;  %v899_v43 = vsel %vm107_vm3, %v4454_v40, 0.0 }
 0x878   :  { %900 = vadd.xlane.f32.xlu1 %v899_v43  ;;  %v896_v44 = vsel %vm107_vm3, %v4456_v42, 0.0 }
 0x879   :  { %897 = vadd.xlane.f32.xlu0 %v896_v44 }
 0x889   :  { %4387 = vrot.lane.b32.xlu1 %v4770_v29, %s4646_s15 }
 0x88d   :  { %1363 = vrot.lane.b32.xlu1 %v4764_v28, %s4647_s16 }
 0x88f   :  { %4382 = vrot.lane.b32.xlu0 %v4770_v29, %s4648_s17 }
 0x893   :  { %1365 = vrot.lane.b32.xlu0 %v4762_v26, %s4647_s16 }
 0x8b1   :  { %1172 = vmax.xlane.f32.xlu1 %v1171_v48 }
 0x8b2   :  { %1175 = vmax.xlane.f32.xlu0 %v1174_v49 }
 0x905   :  { %v901_v28 = vpop.xlane.xlu1 %900 }
 0x906   :  { %4457 = vrcp.f32 %v901_v28  ;;  %v898_v50 = vpop.xlane.xlu0 %897 }
 0x907   :  { %4459 = vrcp.f32 %v898_v50 }
 0x909   :  { %v4388_v10 = vpop.permute.xlu1 %4387 }
 0x90a   :  { %v4390_v51 = vunpack.i.h.bf16 %v4388_v10  ;;  %v4389_v52 = vunpack.i.l.bf16 %v4388_v10  ;;  %v4383_v26 = vpop.permute.xlu0 %4382 }
 0x90b   :  { %v4385_v53 = vunpack.i.h.bf16 %v4383_v26  ;;  %v4384_v54 = vunpack.i.l.bf16 %v4383_v26 }
 0x90c   :  { %v4203_v55 = vpack.c.bf16 %v4390_v51, %v4389_v52 }
 0x90d   :  { %v4189_v56 = vpack.c.bf16 %v4385_v53, %v4384_v54  ;;  %v1364_v57 = vpop.permute.xlu1 %1363 }
 0x90e   :  { %4205 = vmatprep.subr.msk.bf16.mxu0 %vm4786_vm7, %v4203_v55  ;;  %3965 = vmatprep.mubr.msk.f32.mxu0 %vm505_vm6, %v1364_v57  ;;  %v1366_v0 = vpop.permute.xlu0 %1365 }
 0x90f   :  { %4190 = vmatprep.subr.bf16.mxu1 %v4189_v56  ;;  %4208 = vmatpush3.bf16.xpose.msk.msra.mxu0 %vm4786_vm7, %v4203_v55  ;;  %v497_v55 = vld [vmem:[#allocation7 + $0x98] sm:$0xff] }
 0x910   :  { %v4458_v58 = vpop.eup %4457  ;;  %4192 = vmatpush3.bf16.msra.mxu1 %v4189_v56 }
 0x911   :  { %v4460_v59 = vpop.eup %4459  ;;  %v905_v63 = vmul.f32 %v4458_v58, %v4454_v40  ;;  %3937 = vmatprep.subr.mxu1 %v495_v13 }
 0x912   :  { %v904_v61 = vmul.f32 %v4460_v59, %v4456_v42 }
 0x914   :  { %3934 = vmatprep.mubr.msk.f32.mxu1 %vm107_vm3, %v904_v61 }
 0x915   :  { %3935 = vmatmul.mubr.msk.f32.vlgmr.msra.gmra.mrb[8].mxu1 %vm107_vm3, %v905_v63  ;;  %v3627_v63 = vld [vmem:[#allocation7 + $0xa0] ss:$0 sm:$0xff] }
 0x916   :  { %3966 = vmatmul.mubr.msk.f32.vlgmr.msra.gmra.mrb[10].mxu0 %vm505_vm6, %v1366_v0  ;;  %3938 = vmatpush3.msra.mxu1 %v495_v13  ;;  %v1676_v13 = vld [vmem:[#allocation7 + $0xb8] sm:$0xff] }
 0x93e   :  { %v1173_v1 = vpop.xlane.xlu1 %1172 }
 0x93f   :  { %v1177_v2 = vsub.f32 %v1169_v46, %v1173_v1  ;;  %v1176_v3 = vpop.xlane.xlu0 %1175 }
 0x940   :  { %v1178_v4 = vsub.f32 %v1170_v47, %v1176_v3 }
 0x941   :  { %v1179_v5 = vmul.f32 1.442695, %v1177_v2 }
 0x942   :  { %v1181_v6 = vmul.f32 1.442695, %v1178_v4 }
 0x943   :  { %4461 = vpow2.f32 %v1179_v5 }
 0x944   :  { %4463 = vpow2.f32 %v1181_v6 }
 0x94d   :  { %v4462_v7 = vpop.eup %4461 }
 0x94e   :  { %v4464_v9 = vpop.eup %4463  ;;  %v1183_v11 = vsel %vm107_vm3, %v4462_v7, 0.0 }
 0x94f   :  { %1184 = vadd.xlane.f32.xlu0 %v1183_v11  ;;  %v1186_v12 = vsel %vm107_vm3, %v4464_v9, 0.0 }
 0x950   :  { %1187 = vadd.xlane.f32.xlu1 %v1186_v12  ;;  %v1675_v12 = vld [vmem:[#allocation7 + $0xb0] sm:$0xff] }
 0x965   :  { %4392 = vrot.lane.b32.xlu0 %v4770_v29, %s4649_s3 }
 0x9dc   :  { %v1185_v14 = vpop.xlane.xlu0 %1184 }
 0x9dd   :  { %4465 = vrcp.f32 %v1185_v14  ;;  %v1188_v15 = vpop.xlane.xlu1 %1187  ;;  %v1677_v14 = vld [vmem:[#allocation7 + $0xc0] sm:$0xff] }
 0x9de   :  { %4467 = vrcp.f32 %v1188_v15  ;;  %v1678_v15 = vld [vmem:[#allocation7 + $0xc8] sm:$0xff] }
 0x9e0   :  { %v4393_v16 = vpop.permute.xlu0 %4392 }
 0x9e1   :  { %v4395_v17 = vunpack.i.h.bf16 %v4393_v16  ;;  %v4394_v18 = vunpack.i.l.bf16 %v4393_v16  ;;  %v4217_v16 = vpack.c.bf16 %v1678_v15, %v1677_v14  ;;  %v1912_v14 = vld [vmem:[#allocation7 + $0x130] sm:$0xff]  ;;  %v1914_v15 = vld [vmem:[#allocation7 + $0x140] sm:$0xff] }
 0x9e3   :  { %v4199_v19 = vpack.c.bf16 %v4395_v17, %v4394_v18 }
 0x9e5   :  { %4200 = vmatprep.subr.bf16.mxu1 %v4199_v19 }
 0x9e7   :  { %v4466_v20 = vpop.eup %4465 }
 0x9e8   :  { %v3936_v21 = vpop.f32.mrb[8].mxu1  ;;  %v4468_v24 = vpop.eup %4467  ;;  %v1191_v27 = vmul.f32 %v4466_v20, %v4462_v7 }
 0x9e9   :  { %v984_v22 = vpop.f32.mrb[9].mxu1  ;;  %v3967_v23 = vpop.f32.mrb[10].mxu0  ;;  %v1192_v32 = vmul.f32 %v4468_v24, %v4464_v9  ;;  %v3652_v24 = vld [vmem:[#allocation7 + $0xa8] ss:$0 sm:$0xff] }
 0x9ea   :  { %3939 = vmatprep.mubr.msk.f32.mxu1 %vm505_vm6, %v984_v22  ;;  %v1445_v25 = vpop.f32.mrb[11].mxu0  ;;  %v1455_v30 = vmul.f32 0.35355338, %v3967_v23 }
 0x9eb   :  { %v1454_v31 = vmul.f32 0.35355338, %v1445_v25  ;;  %3940 = vmatmul.mubr.msk.f32.vlgmr.msra.gmra.mrb[6].mxu1 %vm505_vm6, %v3936_v21 }
 0x9ec   :  { %4202 = vmatpush3.bf16.msra.mxu1 %v4199_v19  ;;  %3953 = vmatprep.mubr.msk.f32.mxu1 %vm107_vm3, %v1191_v27  ;;  %v1457_v36 = vadd.f32 %v1455_v30, %v4802_v41 }
 0x9ed   :  { %v1456_v34 = vadd.f32 %v1454_v31, %v4798_v37  ;;  %3956 = vmatprep.subr.mxu1 %v496_v39 }
 0x9ee   :  { %v1461_v38 = vsel %vm107_vm3, %v1457_v36, -inf }
 0x9ef   :  { %3954 = vmatmul.mubr.msk.f32.vlgmr.msra.gmra.mrb[10].mxu1 %vm107_vm3, %v1192_v32  ;;  %v1458_v35 = vsel %vm107_vm3, %v1456_v34, -inf  ;;  %v1789_v32 = vld [vmem:[#allocation7 + $0xd8] sm:$0xff] }
 0x9f0   :  { %1459 = vmax.xlane.f32.xlu1 %v1458_v35  ;;  %3957 = vmatpush3.msra.mxu1 %v496_v39  ;;  %v1791_v35 = vld [vmem:[#allocation7 + $0xe8] sm:$0xff] }
 0x9f4   :  { %1462 = vmax.xlane.f32.xlu1 %v1461_v38  ;;  %v1792_v38 = vld [vmem:[#allocation7 + $0xf0] sm:$0xff] }
 0x9f5   :  { %v4225_v39 = vpack.c.bf16 %v1792_v38, %v1791_v35 }
 0xa7d   :  { %v1460_v40 = vpop.xlane.xlu1 %1459 }
 0xa7e   :  { %v1464_v42 = vsub.f32 %v1456_v34, %v1460_v40  ;;  %v1790_v34 = vld [vmem:[#allocation7 + $0xe0] sm:$0xff]  ;;  %v1793_v40 = vld [vmem:[#allocation7 + $0xf8] sm:$0xff] }
 0xa80   :  { %v1466_v45 = vmul.f32 1.442695, %v1464_v42  ;;  %v1794_v42 = vld [vmem:[#allocation7 + $0x100] sm:$0xff] }
 0xa81   :  { %v1463_v43 = vpop.xlane.xlu1 %1462 }
 0xa82   :  { %v1465_v44 = vsub.f32 %v1457_v36, %v1463_v43  ;;  %v4221_v36 = vpack.c.bf16 %v1790_v34, %v1789_v32  ;;  %v4229_v43 = vpack.c.bf16 %v1794_v42, %v1793_v40  ;;  %v3662_v32 = vld [vmem:[#allocation7 + $0x148] ss:$0 sm:$0xff] }
 0xa84   :  { %v1468_v8 = vmul.f32 1.442695, %v1465_v44  ;;  %v1795_v44 = vld [vmem:[#allocation7 + $0x108] sm:$0xff] }
 0xa86   :  { %4469 = vpow2.f32 %v1468_v8 }
 0xa87   :  { %4471 = vpow2.f32 %v1466_v45  ;;  %v1796_v45 = vld [vmem:[#allocation7 + $0x110] sm:$0xff] }
 0xa88   :  { %v4233_v8 = vpack.c.bf16 %v1796_v45, %v1795_v44 }
 0xa90   :  { %v4470_v46 = vpop.eup %4469 }
 0xa91   :  { %v1473_v47 = vsel %vm107_vm3, %v4470_v46, 0.0  ;;  %v4472_v48 = vpop.eup %4471 }
 0xa92   :  { %1474 = vadd.xlane.f32.xlu1 %v1473_v47  ;;  %v1470_v49 = vsel %vm107_vm3, %v4472_v48, 0.0 }
 0xa96   :  { %1471 = vadd.xlane.f32.xlu1 %v1470_v49 }
 0xaa7   :  { %4397 = vrot.lane.b32.xlu1 %v4770_v29, %s4650_s18 }
 0xac2   :  { %v3955_v28 = vpop.f32.mrb[10].mxu1 }
 0xac3   :  { %v1271_v50 = vpop.f32.mrb[11].mxu1 }
 0xac4   :  { %3958 = vmatprep.mubr.msk.f32.mxu1 %vm505_vm6, %v1271_v50 }
 0xac5   :  { %3959 = vmatmul.mubr.msk.f32.vlgmr.msra.gmra.mrb[6].mxu1 %vm505_vm6, %v3955_v28 }
 0xb1f   :  { %v1475_v10 = vpop.xlane.xlu1 %1474 }
 0xb20   :  { %4473 = vrcp.f32 %v1475_v10 }
 0xb23   :  { %v1472_v51 = vpop.xlane.xlu1 %1471 }
 0xb24   :  { %4475 = vrcp.f32 %v1472_v51 }
 0xb27   :  { %v4398_v52 = vpop.permute.xlu1 %4397 }
 0xb28   :  { %v4400_v26 = vunpack.i.h.bf16 %v4398_v52  ;;  %v4399_v53 = vunpack.i.l.bf16 %v4398_v52 }
 0xb2a   :  { %v4209_v54 = vpack.c.bf16 %v4400_v26, %v4399_v53  ;;  %v4474_v56 = vpop.eup %4473 }
 0xb2b   :  { %v1479_v58 = vmul.f32 %v4474_v56, %v4470_v46  ;;  %v3653_v46 = vld [vmem:[#allocation7 + $0xd0] ss:$0 sm:$0xff] }
 0xb2c   :  { %4210 = vmatprep.subr.bf16.mxu1 %v4209_v54 }
 0xb2d   :  { %4212 = vmatpush3.bf16.msra.mxu1 %v4209_v54 }
 0xb2e   :  { %v4476_v57 = vpop.eup %4475  ;;  %3975 = vmatprep.subr.mxu1 %v497_v55 }
 0xb2f   :  { %v1478_v29 = vmul.f32 %v4476_v57, %v4472_v48 }
 0xb31   :  { %3972 = vmatprep.mubr.msk.f32.mxu1 %vm107_vm3, %v1478_v29 }
 0xb32   :  { %3973 = vmatmul.mubr.msk.f32.vlgmr.msra.gmra.mrb[12].mxu1 %vm107_vm3, %v1479_v58 }
 0xb33   :  { %3976 = vmatpush3.msra.mxu1 %v497_v55 }
 0xb34   :  { %4222 = vmatprep.subr.bf16.mxu1 %v4221_v36 }
 0xc05   :  { %v3974_v59 = vpop.f32.mrb[12].mxu1 }
 0xc06   :  { %v1558_v61 = vpop.f32.mrb[13].mxu1 }
 0xc07   :  { %3977 = vmatprep.mubr.msk.f32.mxu1 %vm505_vm6, %v1558_v61 }
 0xc08   :  { %3978 = vmatmul.mubr.msk.f32.vlgmr.msra.gmra.mrb[6].mxu1 %vm505_vm6, %v3974_v59 }
 0xc09   :  { %4224 = vmatpush3.bf16.msra.mxu1 %v4221_v36 }
 0xc0a   :  { %4226 = vmatprep.subr.bf16.mxu1 %v4225_v39 }
 0xc0d   :  { %4228 = vmatpush3.bf16.msra.mxu1 %v4225_v39 }
 0xc0e   :  { %4230 = vmatprep.subr.bf16.mxu1 %v4229_v43 }
 0xc11   :  { %4232 = vmatpush3.bf16.msra.mxu1 %v4229_v43 }
 0xc12   :  { %4234 = vmatprep.subr.bf16.mxu1 %v4233_v8 }
 0xc15   :  { %4236 = vmatpush3.bf16.msra.mxu1 %v4233_v8 }
 0xcdb   :  { %v3979_v0 = vpop.f32.mrb[6].mxu1 }
 0xcdc   :  { %v4323_v1 = vadd.f32 %v3979_v0, %v3627_v63  ;;  %v1639_v2 = vpop.f32.mrb[7].mxu1  ;;  %v3660_v0 = vld [vmem:[#allocation7 + $0x118] ss:$0 sm:$0xff] }
 0xcdd   :  { %v4324_v3 = vadd.f32 %v3627_v63, %v1639_v2 }
 0xcde   :  { %v4879_v4 = vadd.f32 %v4323_v1, %v4748_v60  ;;  %v4213_v60 = vpack.c.bf16 %v1676_v13, %v1675_v12 }
 0xcdf   :  { %v4882_v5 = vadd.f32 %v4324_v3, %v4750_v62 }
 0xce0   :  { %v1654_v6 = vmul.f32 %v4879_v4, %v4879_v4  ;;  %4214 = vmatprep.subr.bf16.mxu0 %v4213_v60 }
 0xce1   :  { %v1653_v7 = vmul.f32 %v4882_v5, %v4882_v5  ;;  %4216 = vmatpush3.bf16.msra.mxu0 %v4213_v60  ;;  %v1913_v60 = vld [vmem:[#allocation7 + $0x138] sm:$0xff] }
 0xce2   :  { %v1658_v9 = vsel %vm288_vm5, %v1654_v6, 0.0  ;;  %4218 = vmatprep.subr.bf16.mxu0 %v4217_v16 }
 0xce3   :  { %1659 = vadd.xlane.f32.xlu1 %v1658_v9  ;;  %v1655_v11 = vsel %vm288_vm5, %v1653_v7, 0.0 }
 0xce4   :  { %1656 = vadd.xlane.f32.xlu0 %v1655_v11 }
 0xce5   :  { %4220 = vmatpush3.bf16.msra.mxu0 %v4217_v16  ;;  %v4241_v16 = vpack.c.bf16 %v1914_v15, %v1913_v60 }
 0xd70   :  { %v1660_v62 = vpop.xlane.xlu1 %1659 }
 0xd71   :  { %v1662_v17 = vmul.f32 0.03125, %v1660_v62  ;;  %v1657_v18 = vpop.xlane.xlu0 %1656 }
 0xd72   :  { %v1661_v19 = vmul.f32 0.03125, %v1657_v18 }
 0xd73   :  { %v1664_v20 = vadd.f32 1e-06, %v1662_v17 }
 0xd74   :  { %v1663_v21 = vadd.f32 1e-06, %v1661_v19 }
 0xd75   :  { %4477 = vrsqrt.f32 %v1664_v20 }
 0xd76   :  { %4479 = vrsqrt.f32 %v1663_v21 }
 0xd7f   :  { %v4478_v22 = vpop.eup %4477 }
 0xd80   :  { %v4480_v23 = vpop.eup %4479  ;;  %v1668_v25 = vmul.f32 %v4478_v22, %v4879_v4 }
 0xd81   :  { %v1667_v27 = vmul.f32 %v4480_v23, %v4882_v5 }
 0xd82   :  { %v1674_v31 = vmul.f32 %v3652_v24, %v1668_v25 }
 0xd83   :  { %v1673_v30 = vmul.f32 %v3652_v24, %v1667_v27  ;;  %v3661_v24 = vld [vmem:[#allocation7 + $0x120] ss:$0 sm:$0xff] }
 0xd85   :  { %3988 = vmatprep.mubr.msk.f32.mxu0 %vm288_vm5, %v1673_v30 }
 0xd86   :  { %3989 = vmatmul.mubr.msk.f32.vlgmr.msra.gmra.mrb[12].mxu0 %vm288_vm5, %v1674_v31 }
 0xe59   :  { %v3990_v47 = vpop.f32.mrb[12].mxu0 }
 0xe5a   :  { %v1762_v48 = vadd.f32 %v3990_v47, %v3653_v46  ;;  %v1756_v49 = vpop.f32.mrb[13].mxu0 }
 0xe5b   :  { %v1757_v28 = vadd.f32 %v3653_v46, %v1756_v49 }
 0xe5c   :  { %1783 = vrot.lane.b32.xlu1 %v1762_v48, %s4634_s28  ;;  %v3657_v10 = vmul.f32 -1.442695, %v1762_v48 }
 0xe5d   :  { %1781 = vrot.lane.b32.xlu0 %v1757_v28, %s4634_s28  ;;  %v3656_v50 = vmul.f32 -1.442695, %v1757_v28 }
 0xe5f   :  { %4481 = vpow2.f32 %v3656_v50 }
 0xe60   :  { %4483 = vpow2.f32 %v3657_v10 }
 0xe69   :  { %v4482_v51 = vpop.eup %4481 }
 0xe6a   :  { %v4484_v52 = vpop.eup %4483  ;;  %v1771_v26 = vadd.f32 1.0, %v4482_v51 }
 0xe6b   :  { %v1772_v53 = vadd.f32 1.0, %v4484_v52 }
 0xe6c   :  { %4485 = vrcp.f32 %v1771_v26 }
 0xe6d   :  { %4487 = vrcp.f32 %v1772_v53 }
 0xe76   :  { %v4486_v54 = vpop.eup %4485 }
 0xe77   :  { %v4488_v55 = vpop.eup %4487  ;;  %v1777_v57 = vmul.f32 %v4486_v54, %v1757_v28 }
 0xe78   :  { %v1778_v29 = vmul.f32 %v4488_v55, %v1762_v48 }
 0xece   :  { %v1784_v56 = vpop.permute.xlu1 %1783 }
 0xecf   :  { %v1782_v58 = vpop.permute.xlu0 %1781  ;;  %v1788_v61 = vmul.f32 %v1784_v56, %v1778_v29 }
 0xed0   :  { %v1787_v59 = vmul.f32 %v1782_v58, %v1777_v57 }
 0xed2   :  { %4007 = vmatprep.mubr.msk.f32.mxu1 %vm1797_vm8, %v1787_v59 }
 0xed3   :  { %4008 = vmatmul.mubr.msk.f32.vlgmr.msra.gmra.mrb[14].mxu1 %vm1797_vm8, %v1788_v61 }
 0xfa6   :  { %v4009_v63 = vpop.f32.mrb[14].mxu1 }
 0xfa7   :  { %v1880_v1 = vadd.f32 %v4009_v63, %v4879_v4  ;;  %v1870_v2 = vpop.f32.mrb[15].mxu1  ;;  %v1911_v4 = vld [vmem:[#allocation7 + $0x128] sm:$0xff] }
 0xfa8   :  { %v1879_v3 = vadd.f32 %v1870_v2, %v4882_v5  ;;  %v4237_v5 = vpack.c.bf16 %v1912_v14, %v1911_v4 }
 0xfa9   :  { %v4900_v6 = vadd.f32 %v3660_v0, %v1880_v1 }
 0xfaa   :  { %v4902_v7 = vadd.f32 %v3660_v0, %v1879_v3  ;;  %4238 = vmatprep.subr.bf16.mxu0 %v4237_v5 }
 0xfab   :  { %v1890_v9 = vmul.f32 %v4900_v6, %v4900_v6  ;;  %4240 = vmatpush3.bf16.msra.mxu0 %v4237_v5 }
 0xfac   :  { %v1889_v11 = vmul.f32 %v4902_v7, %v4902_v7  ;;  %4242 = vmatprep.subr.bf16.mxu0 %v4241_v16 }
 0xfad   :  { %v1894_v12 = vsel %vm288_vm5, %v1890_v9, 0.0 }
 0xfae   :  { %1895 = vadd.xlane.f32.xlu1 %v1894_v12  ;;  %v1891_v13 = vsel %vm288_vm5, %v1889_v11, 0.0 }
 0xfaf   :  { %1892 = vadd.xlane.f32.xlu0 %v1891_v13  ;;  %4244 = vmatpush3.bf16.msra.mxu0 %v4241_v16 }
0x103b   :  { %v1896_v62 = vpop.xlane.xlu1 %1895 }
0x103c   :  { %v1898_v17 = vmul.f32 0.03125, %v1896_v62  ;;  %v1893_v18 = vpop.xlane.xlu0 %1892 }
0x103d   :  { %v1897_v19 = vmul.f32 0.03125, %v1893_v18 }
0x103e   :  { %v1900_v20 = vadd.f32 1e-06, %v1898_v17 }
0x103f   :  { %v1899_v21 = vadd.f32 1e-06, %v1897_v19 }
0x1040   :  { %4489 = vrsqrt.f32 %v1900_v20 }
0x1041   :  { %4491 = vrsqrt.f32 %v1899_v21 }
0x104a   :  { %v4490_v22 = vpop.eup %4489 }
0x104b   :  { %v4492_v23 = vpop.eup %4491  ;;  %v1904_v25 = vmul.f32 %v4490_v22, %v4900_v6 }
0x104c   :  { %v1903_v27 = vmul.f32 %v4492_v23, %v4902_v7 }
0x104d   :  { %v1910_v31 = vmul.f32 %v3661_v24, %v1904_v25 }
0x104e   :  { %v1909_v30 = vmul.f32 %v3661_v24, %v1903_v27 }
0x1050   :  { %4018 = vmatprep.mubr.msk.f32.mxu0 %vm288_vm5, %v1909_v30 }
0x1051   :  { %4019 = vmatmul.mubr.msk.f32.vlgmr.msra.gmra.mrb[14].mxu0 %vm288_vm5, %v1910_v31 }
0x1124   :  { %v4020_v34 = vpop.f32.mrb[14].mxu0 }
0x1125   :  { %v4914_v35 = vadd.f32 %v4020_v34, %v3662_v32  ;;  %v1992_v36 = vpop.f32.mrb[15].mxu0 }
0x1126   :  { %v4916_v38 = vadd.f32 %v3662_v32, %v1992_v36  ;;  %v2001_v32 = vld [vmem:[#allocation7 + $0x150] sm:$0xff] }
0x1128   :  { %4025 = vmatprep.mubr.msk.f32.mxu0 %vm505_vm6, %v4916_v38  ;;  %v4922_v39 = vpack.i.bf16 %v4914_v35, %v4916_v38 }
0x112a   :  { %4407 = vrot.lane.b32.xlu1 %v4922_v39, %s4641_s2  ;;  %4402 = vrot.lane.b32.xlu0 %v4922_v39, %s4640_s0 }
0x112e   :  { %2295 = vrot.lane.b32.xlu0 %v4916_v38, %s4642_s12 }
0x1132   :  { %2297 = vrot.lane.b32.xlu0 %v4914_v35, %s4642_s12 }
0x119c   :  { %v4408_v40 = vpop.permute.xlu1 %4407  ;;  %v4403_v42 = vpop.permute.xlu0 %4402 }
0x119d   :  { %v4410_v43 = vunpack.i.h.bf16 %v4408_v40  ;;  %v4409_v44 = vunpack.i.l.bf16 %v4408_v40  ;;  %v4405_v45 = vunpack.i.h.bf16 %v4403_v42  ;;  %v4404_v8 = vunpack.i.l.bf16 %v4403_v42 }
0x119f   :  { %v4245_v46 = vpack.c.bf16 %v4405_v45, %v4404_v8  ;;  %v4255_v47 = vpack.c.bf16 %v4410_v43, %v4409_v44 }
0x11a0   :  { %v2296_v48 = vpop.permute.xlu0 %2295 }
0x11a1   :  { %4247 = vmatprep.subr.msk.bf16.mxu0 %vm4786_vm7, %v4245_v46 }
0x11a2   :  { %4250 = vmatpush3.bf16.xpose.msk.msra.mxu0 %vm4786_vm7, %v4245_v46 }
0x11a3   :  { %4257 = vmatprep.subr.msk.bf16.mxu0 %vm4786_vm7, %v4255_v47 }
0x11a4   :  { %v2298_v49 = vpop.permute.xlu0 %2297 }
0x11a9   :  { %4026 = vmatmul.mubr.msk.f32.vlgmr.msra.gmra.mrb[16].mxu0 %vm505_vm6, %v4914_v35 }
0x11aa   :  { %4260 = vmatpush3.bf16.xpose.msk.msra.mxu0 %vm4786_vm7, %v4255_v47  ;;  %4044 = vmatprep.mubr.msk.f32.mxu0 %vm505_vm6, %v2296_v48 }
0x11b1   :  { %4045 = vmatmul.mubr.msk.f32.vlgmr.msra.gmra.mrb[18].mxu0 %vm505_vm6, %v2298_v49 }
0x127c   :  { %v4027_v28 = vpop.f32.mrb[16].mxu0 }
0x127d   :  { %v2096_v50 = vmul.f32 0.35355338, %v4027_v28  ;;  %v2086_v10 = vpop.f32.mrb[17].mxu0 }
0x127e   :  { %v2095_v51 = vmul.f32 0.35355338, %v2086_v10 }
0x127f   :  { %v2098_v52 = vadd.f32 %v2096_v50, %v4802_v41 }
0x1280   :  { %v2097_v26 = vadd.f32 %v2095_v51, %v4798_v37 }
0x1281   :  { %v2102_v53 = vsel %vm107_vm3, %v2098_v52, -inf }
0x1282   :  { %2103 = vmax.xlane.f32.xlu1 %v2102_v53  ;;  %v2099_v54 = vsel %vm107_vm3, %v2097_v26, -inf }
0x1283   :  { %2100 = vmax.xlane.f32.xlu0 %v2099_v54 }
0x1284   :  { %v4046_v55 = vpop.f32.mrb[18].mxu0 }
0x1285   :  { %v2377_v56 = vpop.f32.mrb[19].mxu0  ;;  %v2387_v17 = vmul.f32 0.35355338, %v4046_v55 }
0x1286   :  { %v2386_v57 = vmul.f32 0.35355338, %v2377_v56 }
0x1287   :  { %v2389_v18 = vadd.f32 %v2387_v17, %v4802_v41 }
0x1288   :  { %v2388_v29 = vadd.f32 %v2386_v57, %v4798_v37 }
0x1289   :  { %v2393_v19 = vsel %vm107_vm3, %v2389_v18, -inf }
0x128a   :  { %v2390_v58 = vsel %vm107_vm3, %v2388_v29, -inf }
0x1293   :  { %4417 = vrot.lane.b32.xlu1 %v4922_v39, %s4643_s13 }
0x1297   :  { %2582 = vrot.lane.b32.xlu1 %v4916_v38, %s4644_s14 }
0x12bb   :  { %2391 = vmax.xlane.f32.xlu1 %v2390_v58 }
0x130f   :  { %v2104_v59 = vpop.xlane.xlu1 %2103 }
0x1310   :  { %v2106_v61 = vsub.f32 %v2098_v52, %v2104_v59  ;;  %v2101_v63 = vpop.xlane.xlu0 %2100 }
0x1311   :  { %v2105_v0 = vsub.f32 %v2097_v26, %v2101_v63 }
0x1312   :  { %v2109_v1 = vmul.f32 1.442695, %v2106_v61 }
0x1313   :  { %v2107_v2 = vmul.f32 1.442695, %v2105_v0  ;;  %v4418_v3 = vpop.permute.xlu1 %4417 }
0x1314   :  { %4493 = vpow2.f32 %v2109_v1  ;;  %v4420_v9 = vunpack.i.h.bf16 %v4418_v3  ;;  %v4419_v11 = vunpack.i.l.bf16 %v4418_v3 }
0x1315   :  { %4495 = vpow2.f32 %v2107_v2 }
0x1316   :  { %v4265_v12 = vpack.c.bf16 %v4420_v9, %v4419_v11  ;;  %v2002_v9 = vld [vmem:[#allocation7 + $0x158] sm:$0xff] }
0x1317   :  { %v2583_v13 = vpop.permute.xlu1 %2582 }
0x1318   :  { %4267 = vmatprep.subr.msk.bf16.mxu0 %vm4786_vm7, %v4265_v12  ;;  %4063 = vmatprep.mubr.msk.f32.mxu0 %vm505_vm6, %v2583_v13 }
0x1319   :  { %4270 = vmatpush3.bf16.xpose.msk.msra.mxu0 %vm4786_vm7, %v4265_v12 }
0x131e   :  { %v4494_v4 = vpop.eup %4493 }
0x131f   :  { %v2114_v14 = vsel %vm107_vm3, %v4494_v4, 0.0  ;;  %v4496_v60 = vpop.eup %4495 }
0x1320   :  { %2115 = vadd.xlane.f32.xlu0 %v2114_v14  ;;  %v2111_v5 = vsel %vm107_vm3, %v4496_v60, 0.0 }
0x1324   :  { %2112 = vadd.xlane.f32.xlu0 %v2111_v5 }
0x133a   :  { %4412 = vrot.lane.b32.xlu0 %v4922_v39, %s4634_s28 }
0x133e   :  { %2584 = vrot.lane.b32.xlu0 %v4914_v35, %s4644_s14 }
0x1348   :  { %v2392_v15 = vpop.xlane.xlu1 %2391 }
0x1349   :  { %v2396_v16 = vsub.f32 %v2388_v29, %v2392_v15 }
0x134b   :  { %v2398_v62 = vmul.f32 1.442695, %v2396_v16 }
0x134d   :  { %4497 = vpow2.f32 %v2398_v62 }
0x1357   :  { %v4967_v20 = vpop.eup %4497 }
0x1358   :  { %v2402_v21 = vsel %vm107_vm3, %v4967_v20, 0.0 }
0x135d   :  { %2394 = vmax.xlane.f32.xlu0 %v2393_v19 }
0x1361   :  { %2403 = vadd.xlane.f32.xlu0 %v2402_v21 }
0x1377   :  { %4422 = vrot.lane.b32.xlu0 %v4922_v39, %s4648_s17 }
0x137b   :  { %2871 = vrot.lane.b32.xlu0 %v4914_v35, %s4647_s16 }
0x13ad   :  { %v2116_v22 = vpop.xlane.xlu0 %2115 }
0x13ae   :  { %4499 = vrcp.f32 %v2116_v22 }
0x13b1   :  { %v2113_v23 = vpop.xlane.xlu0 %2112 }
0x13b2   :  { %4501 = vrcp.f32 %v2113_v23 }
0x13b5   :  { %v4413_v24 = vpop.permute.xlu0 %4412 }
0x13b6   :  { %v4415_v25 = vunpack.i.h.bf16 %v4413_v24  ;;  %v4414_v27 = vunpack.i.l.bf16 %v4413_v24 }
0x13b8   :  { %v4251_v30 = vpack.c.bf16 %v4415_v25, %v4414_v27  ;;  %v4500_v34 = vpop.eup %4499 }
0x13b9   :  { %v2585_v31 = vpop.permute.xlu0 %2584  ;;  %v2120_v42 = vmul.f32 %v4500_v34, %v4494_v4 }
0x13ba   :  { %4252 = vmatprep.subr.bf16.mxu1 %v4251_v30  ;;  %4064 = vmatmul.mubr.msk.f32.vlgmr.msra.gmra.mrb[20].mxu0 %vm505_vm6, %v2585_v31 }
0x13bb   :  { %4254 = vmatpush3.bf16.msra.mxu1 %v4251_v30 }
0x13bc   :  { %v4502_v36 = vpop.eup %4501  ;;  %4035 = vmatprep.subr.mxu1 %v2001_v32 }
0x13bd   :  { %v2119_v40 = vmul.f32 %v4502_v36, %v4496_v60 }
0x13bf   :  { %4032 = vmatprep.mubr.msk.f32.mxu1 %vm107_vm3, %v2119_v40 }
0x13c0   :  { %4033 = vmatmul.mubr.msk.f32.vlgmr.msra.gmra.mrb[16].mxu1 %vm107_vm3, %v2120_v42 }
0x13c1   :  { %4036 = vmatpush3.msra.mxu1 %v2001_v32 }
0x13ea   :  { %v2395_v35 = vpop.xlane.xlu0 %2394 }
0x13eb   :  { %v2397_v43 = vsub.f32 %v2389_v18, %v2395_v35 }
0x13ed   :  { %v2400_v44 = vmul.f32 1.442695, %v2397_v43 }
0x13ee   :  { %v2404_v45 = vpop.xlane.xlu0 %2403 }
0x13ef   :  { %4503 = vpow2.f32 %v2400_v44 }
0x13f0   :  { %4505 = vrcp.f32 %v2404_v45 }
0x13f2   :  { %v4423_v8 = vpop.permute.xlu0 %4422 }
0x13f3   :  { %v4425_v46 = vunpack.i.h.bf16 %v4423_v8  ;;  %v4424_v47 = vunpack.i.l.bf16 %v4423_v8 }
0x13f5   :  { %v4261_v48 = vpack.c.bf16 %v4425_v46, %v4424_v47 }
0x13f6   :  { %v2872_v33 = vpop.permute.xlu0 %2871 }
0x13f7   :  { %4262 = vmatprep.subr.bf16.mxu1 %v4261_v48 }
0x13f9   :  { %v4504_v49 = vpop.eup %4503 }
0x13fa   :  { %v2405_v28 = vsel %vm107_vm3, %v4504_v49, 0.0  ;;  %v4506_v58 = vpop.eup %4505 }
0x13fb   :  { %2406 = vadd.xlane.f32.xlu1 %v2405_v28  ;;  %v2410_v2 = vmul.f32 %v4506_v58, %v4967_v20 }
0x140c   :  { %4427 = vrot.lane.b32.xlu1 %v4922_v39, %s4646_s15 }
0x1410   :  { %2869 = vrot.lane.b32.xlu1 %v4916_v38, %s4647_s16 }
0x1488   :  { %v2407_v50 = vpop.xlane.xlu1 %2406 }
0x1489   :  { %4507 = vrcp.f32 %v2407_v50 }
0x148c   :  { %v4428_v10 = vpop.permute.xlu1 %4427 }
0x148d   :  { %v4430_v51 = vunpack.i.h.bf16 %v4428_v10  ;;  %v4429_v52 = vunpack.i.l.bf16 %v4428_v10  ;;  %v4065_v26 = vpop.f32.mrb[20].mxu0  ;;  %v2003_v10 = vld [vmem:[#allocation7 + $0x160] sm:$0xff] }
0x148e   :  { %v2674_v53 = vmul.f32 0.35355338, %v4065_v26  ;;  %v2664_v54 = vpop.f32.mrb[21].mxu0 }
0x148f   :  { %v4275_v55 = vpack.c.bf16 %v4430_v51, %v4429_v52  ;;  %v2673_v56 = vmul.f32 0.35355338, %v2664_v54 }
0x1490   :  { %v2870_v57 = vpop.permute.xlu1 %2869  ;;  %v2676_v29 = vadd.f32 %v2674_v53, %v4802_v41 }
0x1491   :  { %4277 = vmatprep.subr.msk.bf16.mxu0 %vm4786_vm7, %v4275_v55  ;;  %4082 = vmatprep.mubr.msk.f32.mxu0 %vm505_vm6, %v2870_v57  ;;  %v2675_v38 = vadd.f32 %v2673_v56, %v4798_v37 }
0x1492   :  { %4280 = vmatpush3.bf16.xpose.msk.msra.mxu0 %vm4786_vm7, %v4275_v55  ;;  %v2680_v59 = vsel %vm107_vm3, %v2676_v29, -inf }
0x1493   :  { %2681 = vmax.xlane.f32.xlu0 %v2680_v59  ;;  %v4034_v61 = vpop.f32.mrb[16].mxu1  ;;  %v2677_v63 = vsel %vm107_vm3, %v2675_v38, -inf  ;;  %v4508_v1 = vpop.eup %4507 }
0x1494   :  { %2678 = vmax.xlane.f32.xlu1 %v2677_v63  ;;  %v2199_v0 = vpop.f32.mrb[17].mxu1  ;;  %v2411_v3 = vmul.f32 %v4508_v1, %v4504_v49 }
0x1495   :  { %4037 = vmatprep.mubr.msk.f32.mxu1 %vm505_vm6, %v2199_v0  ;;  %v3673_v0 = vld [vmem:[#allocation7 + $0x170] ss:$0 sm:$0xff] }
0x1496   :  { %4038 = vmatmul.mubr.msk.f32.vlgmr.msra.gmra.mrb[18].mxu1 %vm505_vm6, %v4034_v61 }
0x1497   :  { %4264 = vmatpush3.bf16.msra.mxu1 %v4261_v48  ;;  %4051 = vmatprep.mubr.msk.f32.mxu1 %vm107_vm3, %v2410_v2 }
0x1498   :  { %4054 = vmatprep.subr.mxu1 %v2002_v9 }
0x1499   :  { %4083 = vmatmul.mubr.msk.f32.vlgmr.msra.gmra.mrb[22].mxu0 %vm505_vm6, %v2872_v33 }
0x149a   :  { %4052 = vmatmul.mubr.msk.f32.vlgmr.msra.gmra.mrb[20].mxu1 %vm107_vm3, %v2411_v3 }
0x149b   :  { %4055 = vmatpush3.msra.mxu1 %v2002_v9 }
0x1520   :  { %v2682_v11 = vpop.xlane.xlu0 %2681 }
0x1521   :  { %v2684_v12 = vsub.f32 %v2676_v29, %v2682_v11  ;;  %v2679_v13 = vpop.xlane.xlu1 %2678  ;;  %v2004_v29 = vld [vmem:[#allocation7 + $0x168] sm:$0xff] }
0x1522   :  { %v2683_v4 = vsub.f32 %v2675_v38, %v2679_v13 }
0x1523   :  { %v2687_v14 = vmul.f32 1.442695, %v2684_v12 }
0x1524   :  { %v2685_v60 = vmul.f32 1.442695, %v2683_v4 }
0x1525   :  { %4509 = vpow2.f32 %v2687_v14 }
0x1526   :  { %4511 = vpow2.f32 %v2685_v60  ;;  %v3181_v60 = vld [vmem:[#allocation7 + $0x180] sm:$0xff] }
0x152f   :  { %v4510_v5 = vpop.eup %4509 }
0x1530   :  { %v4512_v15 = vpop.eup %4511  ;;  %v2692_v16 = vsel %vm107_vm3, %v4510_v5, 0.0 }
0x1531   :  { %2693 = vadd.xlane.f32.xlu1 %v2692_v16  ;;  %v2689_v62 = vsel %vm107_vm3, %v4512_v15, 0.0  ;;  %v3184_v16 = vld [vmem:[#allocation7 + $0x198] sm:$0xff] }
0x1532   :  { %2690 = vadd.xlane.f32.xlu0 %v2689_v62 }
0x1548   :  { %4432 = vrot.lane.b32.xlu0 %v4922_v39, %s4649_s3 }
0x156c   :  { %v4084_v17 = vpop.f32.mrb[22].mxu0 }
0x156d   :  { %v4053_v18 = vpop.f32.mrb[20].mxu1  ;;  %v2951_v19 = vpop.f32.mrb[23].mxu0  ;;  %v2961_v20 = vmul.f32 0.35355338, %v4084_v17 }
0x156e   :  { %v2960_v21 = vmul.f32 0.35355338, %v2951_v19  ;;  %v2490_v22 = vpop.f32.mrb[21].mxu1 }
0x156f   :  { %4056 = vmatprep.mubr.msk.f32.mxu1 %vm505_vm6, %v2490_v22  ;;  %v2963_v25 = vadd.f32 %v2961_v20, %v4802_v41 }
0x1570   :  { %4057 = vmatmul.mubr.msk.f32.vlgmr.msra.gmra.mrb[18].mxu1 %vm505_vm6, %v4053_v18  ;;  %v2962_v23 = vadd.f32 %v2960_v21, %v4798_v37 }
0x1571   :  { %v2967_v27 = vsel %vm107_vm3, %v2963_v25, -inf }
0x1572   :  { %v2964_v24 = vsel %vm107_vm3, %v2962_v23, -inf }
0x1573   :  { %2965 = vmax.xlane.f32.xlu1 %v2964_v24  ;;  %v3698_v24 = vld [vmem:[#allocation7 + $0x178] ss:$0 sm:$0xff] }
0x1577   :  { %2968 = vmax.xlane.f32.xlu1 %v2967_v27 }
0x15be   :  { %v2694_v30 = vpop.xlane.xlu1 %2693 }
0x15bf   :  { %4513 = vrcp.f32 %v2694_v30  ;;  %v2691_v31 = vpop.xlane.xlu0 %2690 }
0x15c0   :  { %4515 = vrcp.f32 %v2691_v31 }
0x15c3   :  { %v4433_v32 = vpop.permute.xlu0 %4432 }
0x15c4   :  { %v4435_v34 = vunpack.i.h.bf16 %v4433_v32  ;;  %v4434_v36 = vunpack.i.l.bf16 %v4433_v32  ;;  %v3295_v32 = vld [vmem:[#allocation7 + $0x1a8] sm:$0xff] }
0x15c6   :  { %v4271_v40 = vpack.c.bf16 %v4435_v34, %v4434_v36  ;;  %v3296_v34 = vld [vmem:[#allocation7 + $0x1b0] sm:$0xff]  ;;  %v3297_v36 = vld [vmem:[#allocation7 + $0x1b8] sm:$0xff] }
0x15c8   :  { %4272 = vmatprep.subr.bf16.mxu1 %v4271_v40 }
0x15c9   :  { %v4514_v42 = vpop.eup %4513  ;;  %4274 = vmatpush3.bf16.msra.mxu1 %v4271_v40  ;;  %v4293_v40 = vpack.c.bf16 %v3296_v34, %v3295_v32 }
0x15ca   :  { %v4516_v37 = vpop.eup %4515  ;;  %v2698_v43 = vmul.f32 %v4514_v42, %v4510_v5  ;;  %4073 = vmatprep.subr.mxu1 %v2003_v10  ;;  %v3182_v5 = vld [vmem:[#allocation7 + $0x188] sm:$0xff]  ;;  %v3298_v42 = vld [vmem:[#allocation7 + $0x1c0] sm:$0xff] }
0x15cb   :  { %v2697_v35 = vmul.f32 %v4516_v37, %v4512_v15  ;;  %v3183_v15 = vld [vmem:[#allocation7 + $0x190] sm:$0xff]  ;;  %v4297_v37 = vpack.c.bf16 %v3298_v42, %v3297_v36 }
0x15cc   :  { %v4289_v62 = vpack.c.bf16 %v3184_v16, %v3183_v15  ;;  %v3423_v15 = vld [vmem:[#allocation7 + $0x208] sm:$0xff]  ;;  %v3424_v16 = vld [vmem:[#allocation7 + $0x210] sm:$0xff] }
0x15cd   :  { %4070 = vmatprep.mubr.msk.f32.mxu1 %vm107_vm3, %v2697_v35  ;;  %v3299_v35 = vld [vmem:[#allocation7 + $0x1c8] sm:$0xff]  ;;  %v3509_v36 = vld [vmem:[#allocation7 + $0x230] sm:$0xff] }
0x15ce   :  { %4071 = vmatmul.mubr.msk.f32.vlgmr.msra.gmra.mrb[22].mxu1 %vm107_vm3, %v2698_v43  ;;  %v3300_v43 = vld [vmem:[#allocation7 + $0x1d0] sm:$0xff] }
0x15cf   :  { %4074 = vmatpush3.msra.mxu1 %v2003_v10 }
0x1600   :  { %v2966_v41 = vpop.xlane.xlu1 %2965 }
0x1601   :  { %v2970_v44 = vsub.f32 %v2962_v23, %v2966_v41  ;;  %v4301_v41 = vpack.c.bf16 %v3300_v43, %v3299_v35 }
0x1603   :  { %v2972_v46 = vmul.f32 1.442695, %v2970_v44  ;;  %v3301_v44 = vld [vmem:[#allocation7 + $0x1d8] sm:$0xff] }
0x1604   :  { %v2969_v45 = vpop.xlane.xlu1 %2968 }
0x1605   :  { %v2971_v8 = vsub.f32 %v2963_v25, %v2969_v45  ;;  %v3302_v45 = vld [vmem:[#allocation7 + $0x1e0] sm:$0xff] }
0x1607   :  { %v2974_v47 = vmul.f32 1.442695, %v2971_v8  ;;  %v4305_v8 = vpack.c.bf16 %v3302_v45, %v3301_v44  ;;  %v3710_v45 = vld [vmem:[#allocation7 + $0x240] ss:$0 sm:$0xff] }
0x1609   :  { %4517 = vpow2.f32 %v2974_v47 }
0x160a   :  { %4519 = vpow2.f32 %v2972_v46  ;;  %v3699_v46 = vld [vmem:[#allocation7 + $0x1a0] ss:$0 sm:$0xff] }
0x1613   :  { %v4518_v48 = vpop.eup %4517 }
0x1614   :  { %v2979_v49 = vsel %vm107_vm3, %v4518_v48, 0.0  ;;  %v4520_v28 = vpop.eup %4519 }
0x1615   :  { %2980 = vadd.xlane.f32.xlu1 %v2979_v49  ;;  %v2976_v50 = vsel %vm107_vm3, %v4520_v28, 0.0 }
0x1619   :  { %2977 = vadd.xlane.f32.xlu1 %v2976_v50 }
0x162a   :  { %4437 = vrot.lane.b32.xlu1 %v4922_v39, %s4650_s18 }
0x16a1   :  { %v4072_v51 = vpop.f32.mrb[22].mxu1 }
0x16a2   :  { %v2981_v52 = vpop.xlane.xlu1 %2980  ;;  %v2777_v26 = vpop.f32.mrb[23].mxu1 }
0x16a3   :  { %4075 = vmatprep.mubr.msk.f32.mxu1 %vm505_vm6, %v2777_v26  ;;  %4521 = vrcp.f32 %v2981_v52 }
0x16a4   :  { %4076 = vmatmul.mubr.msk.f32.vlgmr.msra.gmra.mrb[18].mxu1 %vm505_vm6, %v4072_v51 }
0x16a6   :  { %v2978_v53 = vpop.xlane.xlu1 %2977 }
0x16a7   :  { %4523 = vrcp.f32 %v2978_v53 }
0x16aa   :  { %v4438_v54 = vpop.permute.xlu1 %4437 }
0x16ab   :  { %v4440_v55 = vunpack.i.h.bf16 %v4438_v54  ;;  %v4439_v56 = vunpack.i.l.bf16 %v4438_v54 }
0x16ad   :  { %v4281_v57 = vpack.c.bf16 %v4440_v55, %v4439_v56  ;;  %v4522_v38 = vpop.eup %4521 }
0x16ae   :  { %v2985_v59 = vmul.f32 %v4522_v38, %v4518_v48 }
0x16af   :  { %4282 = vmatprep.subr.bf16.mxu1 %v4281_v57 }
0x16b0   :  { %4284 = vmatpush3.bf16.msra.mxu1 %v4281_v57 }
0x16b1   :  { %v4524_v58 = vpop.eup %4523  ;;  %4092 = vmatprep.subr.mxu1 %v2004_v29 }
0x16b2   :  { %v2984_v39 = vmul.f32 %v4524_v58, %v4520_v28 }
0x16b4   :  { %4089 = vmatprep.mubr.msk.f32.mxu1 %vm107_vm3, %v2984_v39 }
0x16b5   :  { %4090 = vmatmul.mubr.msk.f32.vlgmr.msra.gmra.mrb[24].mxu1 %vm107_vm3, %v2985_v59 }
0x16b6   :  { %4093 = vmatpush3.msra.mxu1 %v2004_v29 }
0x16b7   :  { %4294 = vmatprep.subr.bf16.mxu1 %v4293_v40 }
0x1788   :  { %v4091_v61 = vpop.f32.mrb[24].mxu1 }
0x1789   :  { %v3064_v63 = vpop.f32.mrb[25].mxu1 }
0x178a   :  { %4094 = vmatprep.mubr.msk.f32.mxu1 %vm505_vm6, %v3064_v63 }
0x178b   :  { %4095 = vmatmul.mubr.msk.f32.vlgmr.msra.gmra.mrb[18].mxu1 %vm505_vm6, %v4091_v61  ;;  %v3706_v61 = vld [vmem:[#allocation7 + $0x1e8] ss:$0 sm:$0xff] }
0x178c   :  { %4296 = vmatpush3.bf16.msra.mxu1 %v4293_v40  ;;  %v3510_v40 = vld [vmem:[#allocation7 + $0x238] sm:$0xff] }
0x178d   :  { %4298 = vmatprep.subr.bf16.mxu1 %v4297_v37  ;;  %v4319_v42 = vpack.c.bf16 %v3510_v40, %v3509_v36 }
0x1790   :  { %4300 = vmatpush3.bf16.msra.mxu1 %v4297_v37  ;;  %v3708_v37 = vld [vmem:[#allocation7 + $0x218] ss:$0 sm:$0xff] }
0x1791   :  { %4302 = vmatprep.subr.bf16.mxu1 %v4301_v41 }
0x1794   :  { %4304 = vmatpush3.bf16.msra.mxu1 %v4301_v41 }
0x1795   :  { %4306 = vmatprep.subr.bf16.mxu1 %v4305_v8 }
0x1798   :  { %4308 = vmatpush3.bf16.msra.mxu1 %v4305_v8 }
0x185e   :  { %v4096_v1 = vpop.f32.mrb[18].mxu1 }
0x185f   :  { %v4325_v2 = vadd.f32 %v4096_v1, %v3673_v0  ;;  %v3145_v33 = vpop.f32.mrb[19].mxu1 }
0x1860   :  { %v4326_v3 = vadd.f32 %v3673_v0, %v3145_v33 }
0x1861   :  { %v5021_v9 = vadd.f32 %v4325_v2, %v4900_v6  ;;  %v4285_v6 = vpack.c.bf16 %v3182_v5, %v3181_v60  ;;  %v3421_v60 = vld [vmem:[#allocation7 + $0x1f8] sm:$0xff]  ;;  %v3422_v5 = vld [vmem:[#allocation7 + $0x200] sm:$0xff] }
0x1862   :  { %v5024_v11 = vadd.f32 %v4326_v3, %v4902_v7 }
0x1863   :  { %v3160_v12 = vmul.f32 %v5021_v9, %v5021_v9  ;;  %4286 = vmatprep.subr.bf16.mxu0 %v4285_v6 }
0x1864   :  { %v3159_v13 = vmul.f32 %v5024_v11, %v5024_v11  ;;  %4288 = vmatpush3.bf16.msra.mxu0 %v4285_v6  ;;  %v4651_v6 = vmov 0.0|0.0  }
0x1865   :  { %v3164_v4 = vsel %vm288_vm5, %v3160_v12, 0.0  ;;  %4290 = vmatprep.subr.bf16.mxu0 %v4289_v62 }
0x1866   :  { %3165 = vadd.xlane.f32.xlu1 %v3164_v4  ;;  %v3161_v14 = vsel %vm288_vm5, %v3159_v13, 0.0 }
0x1867   :  { %3162 = vadd.xlane.f32.xlu0 %v3161_v14 }
0x1868   :  { %4292 = vmatpush3.bf16.msra.mxu0 %v4289_v62  ;;  %v4313_v62 = vpack.c.bf16 %v3424_v16, %v3423_v15 }
0x1869   :  { %4309 = vmatprep.subr.bf16.mxu0 %v4651_v6 }
0x18f3   :  { %v3166_v7 = vpop.xlane.xlu1 %3165 }
0x18f4   :  { %v3168_v17 = vmul.f32 0.03125, %v3166_v7  ;;  %v3163_v18 = vpop.xlane.xlu0 %3162 }
0x18f5   :  { %v3167_v19 = vmul.f32 0.03125, %v3163_v18 }
0x18f6   :  { %v3170_v20 = vadd.f32 1e-06, %v3168_v17 }
0x18f7   :  { %v3169_v21 = vadd.f32 1e-06, %v3167_v19 }
0x18f8   :  { %4525 = vrsqrt.f32 %v3170_v20 }
0x18f9   :  { %4527 = vrsqrt.f32 %v3169_v21 }
0x1902   :  { %v4526_v22 = vpop.eup %4525 }
0x1903   :  { %v4528_v23 = vpop.eup %4527  ;;  %v3174_v25 = vmul.f32 %v4526_v22, %v5021_v9 }
0x1904   :  { %v3173_v27 = vmul.f32 %v4528_v23, %v5024_v11  ;;  %v3707_v23 = vld [vmem:[#allocation7 + $0x1f0] ss:$0 sm:$0xff] }
0x1905   :  { %v3180_v31 = vmul.f32 %v3698_v24, %v3174_v25  ;;  %v3508_v25 = vld [vmem:[#allocation7 + $0x228] sm:$0xff] }
0x1906   :  { %v3179_v30 = vmul.f32 %v3698_v24, %v3173_v27  ;;  %v3507_v24 = vld [vmem:[#allocation7 + $0x220] sm:$0xff] }
0x1907   :  { %v4316_v32 = vpack.c.bf16 %v3508_v25, %v3507_v24 }
0x1908   :  { %4105 = vmatprep.mubr.msk.f32.mxu0 %vm288_vm5, %v3179_v30 }
0x1909   :  { %4106 = vmatmul.mubr.msk.f32.vlgmr.msra.gmra.mrb[24].mxu0 %vm288_vm5, %v3180_v31 }
0x19dc   :  { %v4107_v47 = vpop.f32.mrb[24].mxu0 }
0x19dd   :  { %v3268_v48 = vadd.f32 %v4107_v47, %v3699_v46  ;;  %v3262_v49 = vpop.f32.mrb[25].mxu0 }
0x19de   :  { %v3263_v28 = vadd.f32 %v3699_v46, %v3262_v49 }
0x19df   :  { %3289 = vrot.lane.b32.xlu1 %v3268_v48, %s4634_s28  ;;  %v3703_v10 = vmul.f32 -1.442695, %v3268_v48 }
0x19e0   :  { %3287 = vrot.lane.b32.xlu0 %v3263_v28, %s4634_s28  ;;  %v3702_v50 = vmul.f32 -1.442695, %v3263_v28  ;;  %s4654_s28 = smov [#allocation8]  }
0x19e1   :  { %s3597_s19 = sshll.u32 %s4654_s28, 4  ;;  %s3598_s19 = int_to_ptr.vmem [resolvable:$true] %s3597_s19 }
0x19e2   :  { %4529 = vpow2.f32 %v3702_v50  ;;  %s4605_s20 = scalar_lea.vmem %s3598_s19, 32  ;;  %p4610_p11 = scmp.lt.s32.totalorder %s3598_s19, %s3598_s19 }
0x19e3   :  { %4531 = vpow2.f32 %v3703_v10  ;;  %p4606_p10 = scmp.ne.s32.totalorder %s3598_s19, %s4605_s20  ;;  %p4611_p12 = scmp.lt.s32.totalorder %s4605_s20, %s4605_s20 }
0x19e5   :  { %p4612_p13 = por %p4611_p12, %p4610_p11 }
0x19e7   :  { %p4613_p0 = pnand %p4612_p13, %p4606_p10 }
0x19ec   :  { %v4530_v51 = vpop.eup %4529 }
0x19ed   :  { %v4532_v52 = vpop.eup %4531  ;;  %v3277_v26 = vadd.f32 1.0, %v4530_v51 }
0x19ee   :  { %v3278_v53 = vadd.f32 1.0, %v4532_v52 }
0x19ef   :  { %4533 = vrcp.f32 %v3277_v26 }
0x19f0   :  { %4535 = vrcp.f32 %v3278_v53 }
0x19f9   :  { %v4534_v54 = vpop.eup %4533 }
0x19fa   :  { %v4536_v55 = vpop.eup %4535  ;;  %v3283_v57 = vmul.f32 %v4534_v54, %v3263_v28 }
0x19fb   :  { %v3284_v29 = vmul.f32 %v4536_v55, %v3268_v48 }
0x1a51   :  { %v3290_v56 = vpop.permute.xlu1 %3289 }
0x1a52   :  { %v3288_v38 = vpop.permute.xlu0 %3287  ;;  %v3294_v39 = vmul.f32 %v3290_v56, %v3284_v29 }
0x1a53   :  { %v3293_v58 = vmul.f32 %v3288_v38, %v3283_v57 }
0x1a55   :  { %4124 = vmatprep.mubr.msk.f32.mxu1 %vm1797_vm8, %v3293_v58 }
0x1a56   :  { %4125 = vmatmul.mubr.msk.f32.vlgmr.msra.gmra.mrb[26].mxu1 %vm1797_vm8, %v3294_v39 }
0x1b29   :  { %v4126_v59 = vpop.f32.mrb[26].mxu1 }
0x1b2a   :  { %v3385_v63 = vadd.f32 %v4126_v59, %v5021_v9  ;;  %v3375_v0 = vpop.f32.mrb[27].mxu1  ;;  %v4310_v9 = vpack.c.bf16 %v3422_v5, %v3421_v60 }
0x1b2b   :  { %v3384_v1 = vadd.f32 %v3375_v0, %v5024_v11  ;;  %v4653_v11 = vmov 0.0  }
0x1b2c   :  { %v3392_v2 = vadd.f32 %v3706_v61, %v3385_v63  ;;  %4135 = vmatprep.mubr.msk.f32.mxu0 %vm4652_vm11, %v4653_v11  ;;  %4311 = vmatpush3.bf16.msra.mxu0 %v4310_v9 }
0x1b2d   :  { %v3391_v33 = vadd.f32 %v3706_v61, %v3384_v1  ;;  %4312 = vmatprep.subr.bf16.mxu0 %v4651_v6 }
0x1b2e   :  { %v3395_v3 = vmul.f32 %v3392_v2, %v3392_v2 }
0x1b2f   :  { %v3394_v12 = vmul.f32 %v3391_v33, %v3391_v33 }
0x1b30   :  { %v3398_v13 = vrot.slane %v3395_v3, 7  ;;  %4314 = vmatpush3.bf16.msra.mxu0 %v4313_v62 }
0x1b31   :  { %4315 = vmatprep.subr.bf16.mxu0 %v4651_v6 }
0x1b32   :  { %v3400_v4 = vsel %vm3399_vm9, %v3398_v13, %v3394_v12 }
0x1b33   :  { %v3403_v14 = vsel %vm3402_vm10, %v3400_v4, 0.0 }
0x1b34   :  { %3404 = vadd.xlane.f32.xlu0 %v3403_v14 }
0x1bc1   :  { %v3405_v7 = vpop.xlane.xlu0 %3404 }
0x1bc2   :  { %v3406_v17 = vmul.f32 0.03125, %v3405_v7 }
0x1bc4   :  { %v3407_v18 = vadd.f32 1e-06, %v3406_v17 }
0x1bc6   :  { %4537 = vrsqrt.f32 %v3407_v18 }
0x1bd0   :  { %v4538_v19 = vpop.eup %4537 }
0x1bd1   :  { %v3410_v20 = vrot.slane %v4538_v19, 1  ;;  %v3413_v21 = vmul.f32 %v4538_v19, %v3391_v33 }
0x1bd3   :  { %v3414_v22 = vmul.f32 %v3410_v20, %v3392_v2  ;;  %v3419_v30 = vmul.f32 %v3707_v23, %v3413_v21 }
0x1bd5   :  { %v3420_v27 = vmul.f32 %v3707_v23, %v3414_v22 }
0x1bd7   :  { %v3432_v31 = vrot.slane %v3420_v27, 7 }
0x1bd9   :  { %v3433_v34 = vsel %vm3399_vm9, %v3432_v31, %v3419_v30 }
0x1bda   :  { %4136 = vmatmul.mubr.msk.f32.vlgmr.msra.gmra.mrb[26].mxu0 %vm288_vm5, %v3433_v34 }
0x1bdb   :  { %4317 = vmatpush3.bf16.msra.mxu0 %v4316_v32  ;;  %4146 = vmatprep.mubr.msk.f32.mxu0 %vm4652_vm11, %v4653_v11 }
0x1bdc   :  { %4318 = vmatprep.subr.bf16.mxu0 %v4651_v6 }
0x1bdf   :  { %4320 = vmatpush3.bf16.msra.mxu0 %v4319_v42 }
0x1cad   :  { %v3502_v35 = vpop.f32.mrb[26].mxu0 }
0x1cae   :  { %v3503_v43 = vadd.f32 %v3708_v37, %v3502_v35  ;;  %v4137_v41 = vpop.f32.mrb[27].mxu0 }
0x1cb0   :  { %v3506_v44 = vmax.f32 %v3503_v43, 0.0 }
0x1cb2   :  { %4147 = vmatmul.mubr.msk.f32.vlgmr.msra.gmra.mrb[28].mxu0 %vm288_vm5, %v3506_v44 }
0x1d85   :  { %v3585_v8 = vpop.f32.mrb[28].mxu0 }
0x1d86   :  { %v3586_v46 = vadd.f32 %v3710_v45, %v3585_v8  ;;  %v4148_v47 = vpop.f32.mrb[29].mxu0 }
0x1d88   :  { %3590 = vst.msk [vmem:[#allocation8] sm:$0x3] %vm3589_vm12, %v3586_v46 }
0x1d89   :  { %4616 = shalt.err (!%p4613_p0)
}
0x1d8a   :  { %s4617_s23 = scalar_lea.hbm %s5065_s5, 32 }
0x1d8b   :  { %p4618_p1 = scmp.ne.s32.totalorder %s5065_s5, %s4617_s23  ;;  %p4621_p2 = scmp.lt.u32.totalorder %s4617_s23, %s5065_s5 }
0x1d8d   :  { %p4623_p3 = pnand %p4621_p2, %p4618_p1 }
0x1d8f   :  { %4626 = shalt.err (!%p4623_p3)
}
0x1d90   :  { %3600 = dma.vmem_to_hbm [thread:$0]  %s3598_s19, 32, %s5065_s5, [#allocation4]  }
0x1d91   :  { %4631 = dma.done.wait [#allocation4], 32  }
0x1d92   :  { %4632 = vsyncadd [#allocation4], 4294967264 }
0x1d93   :  { %3604 = vsyncpa [#allocation3], 1 }
0x1d94   :  { %3605 = vsyncpa [#allocation6], 1 }
0x1d95   :  { %3606 = vsyncpa [#allocation4], 1 }

</bundles_post_ra>
